<compile_context>
chip_gen: v7x
topology: tpu7x:2x2x1
jax: 0.10.0
libtpu: 0.0.40
codegen_flags: <defaults>
</compile_context>

<pallas_src>
import functools
import math

import jax
import jax.numpy as jnp
from jax import lax
from jax.experimental import pallas as pl
from jax.experimental.pallas import tpu as pltpu


# ------------------------------ in-kernel math ------------------------------

def _gelu(x):
    # TODO(synk): reference module's GELU variant unknown; using tanh-approx GELU (standard BERT).
    return 0.5 * x * (1.0 + jnp.tanh(0.7978845608028654 * (x + 0.044715 * x * x * x)))


def _layer_norm(x, g, b, eps):
    # TODO(synk): nn.LayerNorm default eps=1e-5 assumed (HF BERT uses 1e-12).
    mu = jnp.mean(x, axis=-1, keepdims=True)
    var = jnp.mean(jnp.square(x - mu), axis=-1, keepdims=True)
    return (x - mu) * lax.rsqrt(var + eps) * g + b


def _mm(a, b):
    # bf16 MXU inputs, f32 accumulation (v6e/v7x fast path; harmless on v5e).
    return jnp.dot(a.astype(jnp.bfloat16), b.astype(jnp.bfloat16),
                   preferred_element_type=jnp.float32)


def _mm_nt(a, b):
    # (L, D) x (L, D) contracted on the last dim -> (L, L); avoids an explicit k.T.
    return lax.dot_general(a.astype(jnp.bfloat16), b.astype(jnp.bfloat16),
                           dimension_numbers=(((1,), (1,)), ((), ())),
                           preferred_element_type=jnp.float32)


# -------------------------- fused transformer layer --------------------------

def _layer_kernel(lens_ref,                       # scalar-prefetch: (B,) int32 in SMEM
                  x_ref,                          # (1, L, H)
                  wqkv_ref, bqkv_ref,             # (H, 3H), (1, 3H)
                  wo_ref, bo_ref,                 # (H, H),  (1, H)
                  ln1_g_ref, ln1_b_ref,           # (1, H)
                  w1_ref, b1_ref,                 # (H, I),  (1, I)
                  w2_ref, b2_ref,                 # (I, H),  (1, H)
                  ln2_g_ref, ln2_b_ref,           # (1, H)
                  o_ref,                          # (1, L, H)
                  *, num_heads, head_size, eps, use_mask):
    b = pl.program_id(0)
    x = x_ref[0]                                  # (L, H) f32
    L, H = x.shape

    # --- merged QKV projection (one MXU pass over x) ---
    qkv = _mm(x, wqkv_ref[...]) + bqkv_ref[...]   # (L, 3H) f32
    q = qkv[:, :H] * (1.0 / math.sqrt(head_size)) # fold scale into q
    k = qkv[:, H:2 * H]
    v = qkv[:, 2 * H:]

    # --- attention mask from prefetched true length (no (B,L,L) HBM tensor) ---
    if use_mask:
        tl = lens_ref[b]
        row = lax.broadcasted_iota(jnp.int32, (L, L), 0)
        col = lax.broadcasted_iota(jnp.int32, (L, L), 1)
        valid = (row < tl) & (col < tl)

    # --- per-head attention; accumulate directly into the output projection ---
    wo = wo_ref[...]                              # (H, H)
    acc = None
    for h in range(num_heads):                    # static unroll (small NH)
        sl = slice(h * head_size, (h + 1) * head_size)
        s = _mm_nt(q[:, sl], k[:, sl])            # (L, L) f32
        if use_mask:
            s = jnp.where(valid, s, -1e9)
        s = s - jnp.max(s, axis=-1, keepdims=True)
        p = jnp.exp(s)
        p = p * pl.reciprocal(jnp.sum(p, axis=-1, keepdims=True), approx=True)
        ctx_h = _mm(p, v[:, sl])                  # (L, DH)
        part = _mm(ctx_h, wo[sl, :])              # (L, H) == per-head slice of ctx @ Wo
        acc = part if acc is None else acc + part
    attn_out = acc + bo_ref[...]

    # --- residual + LayerNorm, FFN, residual + LayerNorm (all in VMEM) ---
    x1 = _layer_norm(x + attn_out, ln1_g_ref[...], ln1_b_ref[...], eps)
    ff = _gelu(_mm(x1, w1_ref[...]) + b1_ref[...])
    ff = _mm(ff, w2_ref[...]) + b2_ref[...]
    o_ref[0] = _layer_norm(x1 + ff, ln2_g_ref[...], ln2_b_ref[...], eps)


def transformer_layer(x, lens, p, cfg, eps=1e-5):
    B, L, H = x.shape
    NH, DH, I = cfg["attention_head_num"], cfg["attention_head_size"], cfg["intermediate_size"]
    use_mask = bool(cfg["AttentionMask"])

    wqkv = jnp.concatenate([p["q_w"], p["k_w"], p["v_w"]], axis=1)          # (H, 3H)
    bqkv = jnp.concatenate([p["q_b"], p["k_b"], p["v_b"]]).reshape(1, 3 * H)

    def full(shape):
        # whole-array block; block index is constant -> DMA'd once, reused across grid steps
        return pl.BlockSpec(shape, lambda b, lens_ref, _s=shape: (0,) * len(_s))

    grid_spec = pltpu.PrefetchScalarGridSpec(
        num_scalar_prefetch=1,
        grid=(B,),
        in_specs=[
            pl.BlockSpec((1, L, H), lambda b, lens_ref: (b, 0, 0)),
            full((H, 3 * H)), full((1, 3 * H)),
            full((H, H)), full((1, H)),
            full((1, H)), full((1, H)),
            full((H, I)), full((1, I)),
            full((I, H)), full((1, H)),
            full((1, H)), full((1, H)),
        ],
        out_specs=pl.BlockSpec((1, L, H), lambda b, lens_ref: (b, 0, 0)),
    )
    return pl.pallas_call(
        functools.partial(_layer_kernel, num_heads=NH, head_size=DH,
                          eps=eps, use_mask=use_mask),
        out_shape=jax.ShapeDtypeStruct((B, L, H), jnp.float32),
        grid_spec=grid_spec,
        compiler_params=pltpu.CompilerParams(dimension_semantics=("parallel",)),
    )(lens, x, wqkv, bqkv,
      p["o_w"], p["o_b"].reshape(1, H),
      p["attn_ln_g"].reshape(1, H), p["attn_ln_b"].reshape(1, H),
      p["ff1_w"], p["ff1_b"].reshape(1, I),
      p["ff2_w"], p["ff2_b"].reshape(1, H),
      p["ff_ln_g"].reshape(1, H), p["ff_ln_b"].reshape(1, H))


# ---------------------------- embedding LayerNorm ----------------------------

def _emb_ln_kernel(x_ref, g_ref, b_ref, o_ref, *, eps):
    o_ref[0] = _layer_norm(x_ref[0], g_ref[...], b_ref[...], eps)


def embedding_layer_norm(x, gamma, beta, eps=1e-5):
    B, L, H = x.shape
    return pl.pallas_call(
        functools.partial(_emb_ln_kernel, eps=eps),
        out_shape=jax.ShapeDtypeStruct((B, L, H), jnp.float32),
        grid=(B,),
        in_specs=[pl.BlockSpec((1, L, H), lambda b: (b, 0, 0)),
                  pl.BlockSpec((1, H), lambda b: (0, 0)),
                  pl.BlockSpec((1, H), lambda b: (0, 0))],
        out_specs=pl.BlockSpec((1, L, H), lambda b: (b, 0, 0)),
        compiler_params=pltpu.CompilerParams(dimension_semantics=("parallel",)),
    )(x, gamma.reshape(1, H), beta.reshape(1, H))


# ------------------------------ fused MLM head ------------------------------

def _mlm_head_kernel(x_ref, cw_ref, cb_ref, g_ref, b_ref, dw_ref, db_ref, o_ref, *, eps):
    x = x_ref[0]                                              # (L, H)
    t = _gelu(_mm(x, cw_ref[...]) + cb_ref[...])              # transform dense + gelu
    t = _layer_norm(t, g_ref[...], b_ref[...], eps)           # transform LayerNorm
    o_ref[0] = _mm(t, dw_ref[...]) + db_ref[...]              # decoder (+ bias)


def mlm_head(x, params, cfg, eps=1e-5):
    B, L, H = x.shape
    V = cfg["vocab_size"]
    # TODO(synk): at real BERT sizes the (H, V) decoder weight must be tiled over V
    #             (v7x has only ~32 MiB scoped VMEM); at V=128 a full block is fine.
    return pl.pallas_call(
        functools.partial(_mlm_head_kernel, eps=eps),
        out_shape=jax.ShapeDtypeStruct((B, L, V), jnp.float32),
        grid=(B,),
        in_specs=[pl.BlockSpec((1, L, H), lambda b: (b, 0, 0)),
                  pl.BlockSpec((H, H), lambda b: (0, 0)),
                  pl.BlockSpec((1, H), lambda b: (0, 0)),
                  pl.BlockSpec((1, H), lambda b: (0, 0)),
                  pl.BlockSpec((1, H), lambda b: (0, 0)),
                  pl.BlockSpec((H, V), lambda b: (0, 0)),
                  pl.BlockSpec((1, V), lambda b: (0, 0))],
        out_specs=pl.BlockSpec((1, L, V), lambda b: (b, 0, 0)),
        compiler_params=pltpu.CompilerParams(dimension_semantics=("parallel",)),
    )(x, params["cls_w"], params["cls_b"].reshape(1, H),
      params["cls_ln_g"].reshape(1, H), params["cls_ln_b"].reshape(1, H),
      params["dec_w"], params["dec_b"].reshape(1, V))


# --------------------------- parameter construction --------------------------

def init_params(key, cfg):
    V, H, I, NL, L = (cfg["vocab_size"], cfg["hidden_size"],
                      cfg["intermediate_size"], cfg["num_hidden_layers"],
                      cfg["max_len"])
    ks = iter(jax.random.split(key, 64))
    n = lambda shape: 0.02 * jax.random.normal(next(ks), shape, jnp.float32)
    params = dict(
        token_emb=n((V, H)), type_emb=n((2, H)), pos_emb=n((L, H)),
        emb_ln_g=jnp.ones((H,), jnp.float32), emb_ln_b=jnp.zeros((H,), jnp.float32),
        cls_w=n((H, H)), cls_b=jnp.zeros((H,), jnp.float32),
        cls_ln_g=jnp.ones((H,), jnp.float32), cls_ln_b=jnp.zeros((H,), jnp.float32),
        dec_w=n((H, V)), dec_b=jnp.zeros((V,), jnp.float32),
        layers=[],
    )
    for _ in range(NL):
        params["layers"].append(dict(
            q_w=n((H, H)), q_b=jnp.zeros((H,), jnp.float32),
            k_w=n((H, H)), k_b=jnp.zeros((H,), jnp.float32),
            v_w=n((H, H)), v_b=jnp.zeros((H,), jnp.float32),
            o_w=n((H, H)), o_b=jnp.zeros((H,), jnp.float32),
            attn_ln_g=jnp.ones((H,), jnp.float32), attn_ln_b=jnp.zeros((H,), jnp.float32),
            ff1_w=n((H, I)), ff1_b=jnp.zeros((I,), jnp.float32),
            ff2_w=n((I, H)), ff2_b=jnp.zeros((H,), jnp.float32),
            ff_ln_g=jnp.ones((H,), jnp.float32), ff_ln_b=jnp.zeros((H,), jnp.float32),
        ))
    return params


# ------------------------------- forward pass --------------------------------

def bert_mlm_forward(params, input_token, segment_ids, attention_mask, cfg):
    B, L = input_token.shape

    # BertEmbeddings: word + type + position lookups (gathers are JAX glue),
    # then a Pallas LayerNorm.
    emb = (params["token_emb"][input_token]
           + params["type_emb"][segment_ids]
           + params["pos_emb"][None, :L, :])
    x = embedding_layer_norm(emb, params["emb_ln_g"], params["emb_ln_b"])

    # per-batch true lengths; the (B, L, L) mask is generated inside the layer kernel
    lens = jnp.sum(attention_mask, axis=1).astype(jnp.int32)      # (B,)

    for p in params["layers"]:
        x = transformer_layer(x, lens, p, cfg)

    return mlm_head(x, params, cfg)


# ----------------------------------- main ------------------------------------

if __name__ == "__main__":
    cfg = dict(vocab_size=128, hidden_size=32, attention_head_num=4,
               attention_head_size=8, intermediate_size=64,
               num_hidden_layers=2, max_len=8, AttentionMask=True)

    key = jax.random.PRNGKey(0)
    k_p, k_tok, k_seg = jax.random.split(key, 3)

    params = init_params(k_p, cfg)

    B, L = 2, cfg["max_len"]
    input_token = jax.random.randint(k_tok, (B, L), 0, cfg["vocab_size"], jnp.int32)
    segment_ids = jax.random.randint(k_seg, (B, L), 0, 2, jnp.int32)
    # batch 0 fully valid, batch 1 has 5 real tokens (3 padding)
    attention_mask = jnp.array([[1, 1, 1, 1, 1, 1, 1, 1],
                                [1, 1, 1, 1, 1, 0, 0, 0]], jnp.int32)

    fwd = jax.jit(functools.partial(bert_mlm_forward, cfg=cfg))
    out = fwd(params, input_token, segment_ids, attention_mask)
    out = jax.block_until_ready(out)

    assert out.shape == (B, L, cfg["vocab_size"]) and out.dtype == jnp.float32
    assert bool(jnp.all(jnp.isfinite(out)))
    print("KERNEL_OK")
</pallas_src>

<mosaic_0001>
module attributes {stable_mosaic.version = 11 : i64} {
  func.func @_emb_ln_kernel(%arg0: i32, %arg1: memref<1x8x32xf32, #tpu.memory_space<vmem>>, %arg2: memref<1x32xf32, #tpu.memory_space<vmem>>, %arg3: memref<1x32xf32, #tpu.memory_space<vmem>>, %arg4: memref<1x8x32xf32, #tpu.memory_space<vmem>>) attributes {dimension_semantics = [#tpu.dimension_semantics<parallel>], iteration_bounds = array<i64: 2>, scalar_prefetch = 0 : i64, scratch_operands = 0 : i64, tpu.core_type = #tpu.core_type<tc>, window_params = [{transform_indices = @transform_0, window_bounds = array<i64: 1, 8, 32>}, {pipeline_mode = #tpu.pipeline_mode<synchronous>, transform_indices = @transform_1, window_bounds = array<i64: 1, 32>}, {pipeline_mode = #tpu.pipeline_mode<synchronous>, transform_indices = @transform_2, window_bounds = array<i64: 1, 32>}, {transform_indices = @transform_3, window_bounds = array<i64: 1, 8, 32>}]} {
    %c0 = arith.constant 0 : index
    %c0_0 = arith.constant 0 : index
    %c0_1 = arith.constant 0 : index
    %0 = vector.load %arg1[%c0, %c0_0, %c0_1] : memref<1x8x32xf32, #tpu.memory_space<vmem>>, vector<1x8x32xf32>
    %1 = vector.shape_cast %0 : vector<1x8x32xf32> to vector<8x32xf32>
    %c0_2 = arith.constant 0 : index
    %c0_3 = arith.constant 0 : index
    %2 = vector.load %arg2[%c0_2, %c0_3] : memref<1x32xf32, #tpu.memory_space<vmem>>, vector<1x32xf32>
    %c0_4 = arith.constant 0 : index
    %c0_5 = arith.constant 0 : index
    %3 = vector.load %arg3[%c0_4, %c0_5] : memref<1x32xf32, #tpu.memory_space<vmem>>, vector<1x32xf32>
    %cst = arith.constant dense<0.000000e+00> : vector<8xf32>
    %4 = vector.multi_reduction <add>, %1, %cst [1] : vector<8x32xf32> to vector<8xf32>
    %5 = vector.shape_cast %4 : vector<8xf32> to vector<8x1xf32>
    %cst_6 = arith.constant 3.200000e+01 : f32
    %6 = vector.broadcast %cst_6 : f32 to vector<8x1xf32>
    %7 = arith.divf %5, %6 : vector<8x1xf32>
    %8 = vector.broadcast %7 : vector<8x1xf32> to vector<8x32xf32>
    %9 = arith.subf %1, %8 : vector<8x32xf32>
    %10 = arith.mulf %9, %9 : vector<8x32xf32>
    %cst_7 = arith.constant dense<0.000000e+00> : vector<8xf32>
    %11 = vector.multi_reduction <add>, %10, %cst_7 [1] : vector<8x32xf32> to vector<8xf32>
    %12 = vector.shape_cast %11 : vector<8xf32> to vector<8x1xf32>
    %cst_8 = arith.constant 3.200000e+01 : f32
    %13 = vector.broadcast %cst_8 : f32 to vector<8x1xf32>
    %14 = arith.divf %12, %13 : vector<8x1xf32>
    %15 = vector.broadcast %7 : vector<8x1xf32> to vector<8x32xf32>
    %16 = arith.subf %1, %15 : vector<8x32xf32>
    %cst_9 = arith.constant 9.99999974E-6 : f32
    %17 = vector.broadcast %cst_9 : f32 to vector<8x1xf32>
    %18 = arith.addf %14, %17 : vector<8x1xf32>
    %19 = math.rsqrt %18 : vector<8x1xf32>
    %20 = vector.broadcast %19 : vector<8x1xf32> to vector<8x32xf32>
    %21 = arith.mulf %16, %20 : vector<8x32xf32>
    %22 = vector.broadcast %2 : vector<1x32xf32> to vector<8x32xf32>
    %23 = arith.mulf %21, %22 : vector<8x32xf32>
    %24 = vector.broadcast %3 : vector<1x32xf32> to vector<8x32xf32>
    %25 = arith.addf %23, %24 : vector<8x32xf32>
    %c0_10 = arith.constant 0 : index
    %c0_11 = arith.constant 0 : index
    %c0_12 = arith.constant 0 : index
    %26 = vector.load %arg4[%c0_10, %c0_11, %c0_12] : memref<1x8x32xf32, #tpu.memory_space<vmem>>, vector<1x8x32xf32>
    %27 = vector.shape_cast %26 : vector<1x8x32xf32> to vector<8x32xf32>
    %28 = vector.shape_cast %25 : vector<8x32xf32> to vector<1x8x32xf32>
    tpu.vector_store %arg4[%c0_10, %c0_11, %c0_12], %28 {strides = array<i32>} : memref<1x8x32xf32, #tpu.memory_space<vmem>>, vector<1x8x32xf32>,
    return
  }
  func.func @transform_0(%arg0: i32) -> (i32, i32, i32) {
    %c0_i32 = arith.constant 0 : i32
    %c0_i32_0 = arith.constant 0 : i32
    %c0_i32_1 = arith.constant 0 : i32
    return %arg0, %c0_i32, %c0_i32_0 : i32, i32, i32
  }
  func.func @transform_1(%arg0: i32) -> (i32, i32) {
    %c0_i32 = arith.constant 0 : i32
    %c0_i32_0 = arith.constant 0 : i32
    %c0_i32_1 = arith.constant 0 : i32
    return %c0_i32, %c0_i32_0 : i32, i32
  }
  func.func @transform_2(%arg0: i32) -> (i32, i32) {
    %c0_i32 = arith.constant 0 : i32
    %c0_i32_0 = arith.constant 0 : i32
    %c0_i32_1 = arith.constant 0 : i32
    return %c0_i32, %c0_i32_0 : i32, i32
  }
  func.func @transform_3(%arg0: i32) -> (i32, i32, i32) {
    %c0_i32 = arith.constant 0 : i32
    %c0_i32_0 = arith.constant 0 : i32
    %c0_i32_1 = arith.constant 0 : i32
    return %arg0, %c0_i32, %c0_i32_0 : i32, i32, i32
  }
}

module attributes {stable_mosaic.version = 11 : i64} {
  func.func @_mlm_head_kernel(%arg0: i32, %arg1: memref<1x8x32xf32, #tpu.memory_space<vmem>>, %arg2: memref<32x32xf32, #tpu.memory_space<vmem>>, %arg3: memref<1x32xf32, #tpu.memory_space<vmem>>, %arg4: memref<1x32xf32, #tpu.memory_space<vmem>>, %arg5: memref<1x32xf32, #tpu.memory_space<vmem>>, %arg6: memref<32x128xf32, #tpu.memory_space<vmem>>, %arg7: memref<1x128xf32, #tpu.memory_space<vmem>>, %arg8: memref<1x8x128xf32, #tpu.memory_space<vmem>>) attributes {dimension_semantics = [#tpu.dimension_semantics<parallel>], iteration_bounds = array<i64: 2>, scalar_prefetch = 0 : i64, scratch_operands = 0 : i64, tpu.core_type = #tpu.core_type<tc>, window_params = [{transform_indices = @transform_0, window_bounds = array<i64: 1, 8, 32>}, {pipeline_mode = #tpu.pipeline_mode<synchronous>, transform_indices = @transform_1, window_bounds = array<i64: 32, 32>}, {pipeline_mode = #tpu.pipeline_mode<synchronous>, transform_indices = @transform_2, window_bounds = array<i64: 1, 32>}, {pipeline_mode = #tpu.pipeline_mode<synchronous>, transform_indices = @transform_3, window_bounds = array<i64: 1, 32>}, {pipeline_mode = #tpu.pipeline_mode<synchronous>, transform_indices = @transform_4, window_bounds = array<i64: 1, 32>}, {pipeline_mode = #tpu.pipeline_mode<synchronous>, transform_indices = @transform_5, window_bounds = array<i64: 32, 128>}, {pipeline_mode = #tpu.pipeline_mode<synchronous>, transform_indices = @transform_6, window_bounds = array<i64: 1, 128>}, {transform_indices = @transform_7, window_bounds = array<i64: 1, 8, 128>}]} {
    %c0 = arith.constant 0 : index
    %c0_0 = arith.constant 0 : index
    %c0_1 = arith.constant 0 : index
    %0 = vector.load %arg1[%c0, %c0_0, %c0_1] : memref<1x8x32xf32, #tpu.memory_space<vmem>>, vector<1x8x32xf32>
    %1 = vector.shape_cast %0 : vector<1x8x32xf32> to vector<8x32xf32>
    %c0_2 = arith.constant 0 : index
    %c0_3 = arith.constant 0 : index
    %2 = vector.load %arg2[%c0_2, %c0_3] : memref<32x32xf32, #tpu.memory_space<vmem>>, vector<32x32xf32>
    %3 = arith.truncf %1 : vector<8x32xf32> to vector<8x32xbf16>
    %4 = arith.truncf %2 : vector<32x32xf32> to vector<32x32xbf16>
    %cst = arith.constant dense<0.000000e+00> : vector<8x32xf32>
    %5 = tpu.matmul %3, %4, %cst {dimension_numbers = #tpu.dot_dimension_numbers<[1], [0], [0], [1], [0, 0, 1, 1], [], []>} : vector<8x32xbf16>, vector<32x32xbf16>, vector<8x32xf32> -> vector<8x32xf32>
    %c0_4 = arith.constant 0 : index
    %c0_5 = arith.constant 0 : index
    %6 = vector.load %arg3[%c0_4, %c0_5] : memref<1x32xf32, #tpu.memory_space<vmem>>, vector<1x32xf32>
    %7 = vector.broadcast %6 : vector<1x32xf32> to vector<8x32xf32>
    %8 = arith.addf %5, %7 : vector<8x32xf32>
    %cst_6 = arith.constant 5.000000e-01 : f32
    %9 = vector.broadcast %cst_6 : f32 to vector<8x32xf32>
    %10 = arith.mulf %9, %8 : vector<8x32xf32>
    %cst_7 = arith.constant 4.471500e-02 : f32
    %11 = vector.broadcast %cst_7 : f32 to vector<8x32xf32>
    %12 = arith.mulf %11, %8 : vector<8x32xf32>
    %13 = arith.mulf %12, %8 : vector<8x32xf32>
    %14 = arith.mulf %13, %8 : vector<8x32xf32>
    %15 = arith.addf %8, %14 : vector<8x32xf32>
    %cst_8 = arith.constant 0.797884583 : f32
    %16 = vector.broadcast %cst_8 : f32 to vector<8x32xf32>
    %17 = arith.mulf %16, %15 : vector<8x32xf32>
    %18 = math.tanh %17 : vector<8x32xf32>
    %cst_9 = arith.constant 1.000000e+00 : f32
    %19 = vector.broadcast %cst_9 : f32 to vector<8x32xf32>
    %20 = arith.addf %19, %18 : vector<8x32xf32>
    %21 = arith.mulf %10, %20 : vector<8x32xf32>
    %c0_10 = arith.constant 0 : index
    %c0_11 = arith.constant 0 : index
    %22 = vector.load %arg4[%c0_10, %c0_11] : memref<1x32xf32, #tpu.memory_space<vmem>>, vector<1x32xf32>
    %c0_12 = arith.constant 0 : index
    %c0_13 = arith.constant 0 : index
    %23 = vector.load %arg5[%c0_12, %c0_13] : memref<1x32xf32, #tpu.memory_space<vmem>>, vector<1x32xf32>
    %cst_14 = arith.constant dense<0.000000e+00> : vector<8xf32>
    %24 = vector.multi_reduction <add>, %21, %cst_14 [1] : vector<8x32xf32> to vector<8xf32>
    %25 = vector.shape_cast %24 : vector<8xf32> to vector<8x1xf32>
    %cst_15 = arith.constant 3.200000e+01 : f32
    %26 = vector.broadcast %cst_15 : f32 to vector<8x1xf32>
    %27 = arith.divf %25, %26 : vector<8x1xf32>
    %28 = vector.broadcast %27 : vector<8x1xf32> to vector<8x32xf32>
    %29 = arith.subf %21, %28 : vector<8x32xf32>
    %30 = arith.mulf %29, %29 : vector<8x32xf32>
    %cst_16 = arith.constant dense<0.000000e+00> : vector<8xf32>
    %31 = vector.multi_reduction <add>, %30, %cst_16 [1] : vector<8x32xf32> to vector<8xf32>
    %32 = vector.shape_cast %31 : vector<8xf32> to vector<8x1xf32>
    %cst_17 = arith.constant 3.200000e+01 : f32
    %33 = vector.broadcast %cst_17 : f32 to vector<8x1xf32>
    %34 = arith.divf %32, %33 : vector<8x1xf32>
    %35 = vector.broadcast %27 : vector<8x1xf32> to vector<8x32xf32>
    %36 = arith.subf %21, %35 : vector<8x32xf32>
    %cst_18 = arith.constant 9.99999974E-6 : f32
    %37 = vector.broadcast %cst_18 : f32 to vector<8x1xf32>
    %38 = arith.addf %34, %37 : vector<8x1xf32>
    %39 = math.rsqrt %38 : vector<8x1xf32>
    %40 = vector.broadcast %39 : vector<8x1xf32> to vector<8x32xf32>
    %41 = arith.mulf %36, %40 : vector<8x32xf32>
    %42 = vector.broadcast %22 : vector<1x32xf32> to vector<8x32xf32>
    %43 = arith.mulf %41, %42 : vector<8x32xf32>
    %44 = vector.broadcast %23 : vector<1x32xf32> to vector<8x32xf32>
    %45 = arith.addf %43, %44 : vector<8x32xf32>
    %c0_19 = arith.constant 0 : index
    %c0_20 = arith.constant 0 : index
    %46 = vector.load %arg6[%c0_19, %c0_20] : memref<32x128xf32, #tpu.memory_space<vmem>>, vector<32x128xf32>
    %47 = arith.truncf %45 : vector<8x32xf32> to vector<8x32xbf16>
    %48 = arith.truncf %46 : vector<32x128xf32> to vector<32x128xbf16>
    %cst_21 = arith.constant dense<0.000000e+00> : vector<8x128xf32>
    %49 = tpu.matmul %47, %48, %cst_21 {dimension_numbers = #tpu.dot_dimension_numbers<[1], [0], [0], [1], [0, 0, 1, 1], [], []>} : vector<8x32xbf16>, vector<32x128xbf16>, vector<8x128xf32> -> vector<8x128xf32>
    %c0_22 = arith.constant 0 : index
    %c0_23 = arith.constant 0 : index
    %50 = vector.load %arg7[%c0_22, %c0_23] : memref<1x128xf32, #tpu.memory_space<vmem>>, vector<1x128xf32>
    %51 = vector.broadcast %50 : vector<1x128xf32> to vector<8x128xf32>
    %52 = arith.addf %49, %51 : vector<8x128xf32>
    %c0_24 = arith.constant 0 : index
    %c0_25 = arith.constant 0 : index
    %c0_26 = arith.constant 0 : index
    %53 = vector.load %arg8[%c0_24, %c0_25, %c0_26] : memref<1x8x128xf32, #tpu.memory_space<vmem>>, vector<1x8x128xf32>
    %54 = vector.shape_cast %53 : vector<1x8x128xf32> to vector<8x128xf32>
    %55 = vector.shape_cast %52 : vector<8x128xf32> to vector<1x8x128xf32>
    tpu.vector_store %arg8[%c0_24, %c0_25, %c0_26], %55 {strides = array<i32>} : memref<1x8x128xf32, #tpu.memory_space<vmem>>, vector<1x8x128xf32>,
    return
  }
  func.func @transform_0(%arg0: i32) -> (i32, i32, i32) {
    %c0_i32 = arith.constant 0 : i32
    %c0_i32_0 = arith.constant 0 : i32
    %c0_i32_1 = arith.constant 0 : i32
    return %arg0, %c0_i32, %c0_i32_0 : i32, i32, i32
  }
  func.func @transform_1(%arg0: i32) -> (i32, i32) {
    %c0_i32 = arith.constant 0 : i32
    %c0_i32_0 = arith.constant 0 : i32
    %c0_i32_1 = arith.constant 0 : i32
    return %c0_i32, %c0_i32_0 : i32, i32
  }
  func.func @transform_2(%arg0: i32) -> (i32, i32) {
    %c0_i32 = arith.constant 0 : i32
    %c0_i32_0 = arith.constant 0 : i32
    %c0_i32_1 = arith.constant 0 : i32
    return %c0_i32, %c0_i32_0 : i32, i32
  }
  func.func @transform_3(%arg0: i32) -> (i32, i32) {
    %c0_i32 = arith.constant 0 : i32
    %c0_i32_0 = arith.constant 0 : i32
    %c0_i32_1 = arith.constant 0 : i32
    return %c0_i32, %c0_i32_0 : i32, i32
  }
  func.func @transform_4(%arg0: i32) -> (i32, i32) {
    %c0_i32 = arith.constant 0 : i32
    %c0_i32_0 = arith.constant 0 : i32
    %c0_i32_1 = arith.constant 0 : i32
    return %c0_i32, %c0_i32_0 : i32, i32
  }
  func.func @transform_5(%arg0: i32) -> (i32, i32) {
    %c0_i32 = arith.constant 0 : i32
    %c0_i32_0 = arith.constant 0 : i32
    %c0_i32_1 = arith.constant 0 : i32
    return %c0_i32, %c0_i32_0 : i32, i32
  }
  func.func @transform_6(%arg0: i32) -> (i32, i32) {
    %c0_i32 = arith.constant 0 : i32
    %c0_i32_0 = arith.constant 0 : i32
    %c0_i32_1 = arith.constant 0 : i32
    return %c0_i32, %c0_i32_0 : i32, i32
  }
  func.func @transform_7(%arg0: i32) -> (i32, i32, i32) {
    %c0_i32 = arith.constant 0 : i32
    %c0_i32_0 = arith.constant 0 : i32
    %c0_i32_1 = arith.constant 0 : i32
    return %arg0, %c0_i32, %c0_i32_0 : i32, i32, i32
  }
}

module attributes {stable_mosaic.version = 11 : i64} {
  func.func @_layer_kernel(%arg0: i32, %arg1: memref<2xi32, #tpu.memory_space<smem>>, %arg2: memref<1x8x32xf32, #tpu.memory_space<vmem>>, %arg3: memref<32x96xf32, #tpu.memory_space<vmem>>, %arg4: memref<1x96xf32, #tpu.memory_space<vmem>>, %arg5: memref<32x32xf32, #tpu.memory_space<vmem>>, %arg6: memref<1x32xf32, #tpu.memory_space<vmem>>, %arg7: memref<1x32xf32, #tpu.memory_space<vmem>>, %arg8: memref<1x32xf32, #tpu.memory_space<vmem>>, %arg9: memref<32x64xf32, #tpu.memory_space<vmem>>, %arg10: memref<1x64xf32, #tpu.memory_space<vmem>>, %arg11: memref<64x32xf32, #tpu.memory_space<vmem>>, %arg12: memref<1x32xf32, #tpu.memory_space<vmem>>, %arg13: memref<1x32xf32, #tpu.memory_space<vmem>>, %arg14: memref<1x32xf32, #tpu.memory_space<vmem>>, %arg15: memref<1x8x32xf32, #tpu.memory_space<vmem>>) attributes {dimension_semantics = [#tpu.dimension_semantics<parallel>], iteration_bounds = array<i64: 2>, scalar_prefetch = 1 : i64, scratch_operands = 0 : i64, tpu.core_type = #tpu.core_type<tc>, window_params = [{transform_indices = @transform_0, window_bounds = array<i64: 1, 8, 32>}, {pipeline_mode = #tpu.pipeline_mode<synchronous>, transform_indices = @transform_1, window_bounds = array<i64: 32, 96>}, {pipeline_mode = #tpu.pipeline_mode<synchronous>, transform_indices = @transform_2, window_bounds = array<i64: 1, 96>}, {pipeline_mode = #tpu.pipeline_mode<synchronous>, transform_indices = @transform_3, window_bounds = array<i64: 32, 32>}, {pipeline_mode = #tpu.pipeline_mode<synchronous>, transform_indices = @transform_4, window_bounds = array<i64: 1, 32>}, {pipeline_mode = #tpu.pipeline_mode<synchronous>, transform_indices = @transform_5, window_bounds = array<i64: 1, 32>}, {pipeline_mode = #tpu.pipeline_mode<synchronous>, transform_indices = @transform_6, window_bounds = array<i64: 1, 32>}, {pipeline_mode = #tpu.pipeline_mode<synchronous>, transform_indices = @transform_7, window_bounds = array<i64: 32, 64>}, {pipeline_mode = #tpu.pipeline_mode<synchronous>, transform_indices = @transform_8, window_bounds = array<i64: 1, 64>}, {pipeline_mode = #tpu.pipeline_mode<synchronous>, transform_indices = @transform_9, window_bounds = array<i64: 64, 32>}, {pipeline_mode = #tpu.pipeline_mode<synchronous>, transform_indices = @transform_10, window_bounds = array<i64: 1, 32>}, {pipeline_mode = #tpu.pipeline_mode<synchronous>, transform_indices = @transform_11, window_bounds = array<i64: 1, 32>}, {pipeline_mode = #tpu.pipeline_mode<synchronous>, transform_indices = @transform_12, window_bounds = array<i64: 1, 32>}, {transform_indices = @transform_13, window_bounds = array<i64: 1, 8, 32>}]} {
    %c0 = arith.constant 0 : index
    %c0_0 = arith.constant 0 : index
    %c0_1 = arith.constant 0 : index
    %0 = vector.load %arg2[%c0, %c0_0, %c0_1] : memref<1x8x32xf32, #tpu.memory_space<vmem>>, vector<1x8x32xf32>
    %1 = vector.shape_cast %0 : vector<1x8x32xf32> to vector<8x32xf32>
    %c0_2 = arith.constant 0 : index
    %c0_3 = arith.constant 0 : index
    %2 = vector.load %arg3[%c0_2, %c0_3] : memref<32x96xf32, #tpu.memory_space<vmem>>, vector<32x96xf32>
    %3 = arith.truncf %1 : vector<8x32xf32> to vector<8x32xbf16>
    %4 = arith.truncf %2 : vector<32x96xf32> to vector<32x96xbf16>
    %cst = arith.constant dense<0.000000e+00> : vector<8x96xf32>
    %5 = tpu.matmul %3, %4, %cst {dimension_numbers = #tpu.dot_dimension_numbers<[1], [0], [0], [1], [0, 0, 1, 1], [], []>} : vector<8x32xbf16>, vector<32x96xbf16>, vector<8x96xf32> -> vector<8x96xf32>
    %c0_4 = arith.constant 0 : index
    %c0_5 = arith.constant 0 : index
    %6 = vector.load %arg4[%c0_4, %c0_5] : memref<1x96xf32, #tpu.memory_space<vmem>>, vector<1x96xf32>
    %7 = vector.broadcast %6 : vector<1x96xf32> to vector<8x96xf32>
    %8 = arith.addf %5, %7 : vector<8x96xf32>
    %9 = vector.extract_strided_slice %8 {offsets = [0, 0], sizes = [8, 32], strides = [1, 1]} : vector<8x96xf32> to vector<8x32xf32>
    %cst_6 = arith.constant 0.353553385 : f32
    %10 = vector.broadcast %cst_6 : f32 to vector<8x32xf32>
    %11 = arith.mulf %9, %10 : vector<8x32xf32>
    %12 = vector.extract_strided_slice %8 {offsets = [0, 32], sizes = [8, 32], strides = [1, 1]} : vector<8x96xf32> to vector<8x32xf32>
    %13 = vector.extract_strided_slice %8 {offsets = [0, 64], sizes = [8, 32], strides = [1, 1]} : vector<8x96xf32> to vector<8x32xf32>
    %14 = arith.index_cast %arg0 : i32 to index
    %15 = memref.load %arg1[%14] : memref<2xi32, #tpu.memory_space<smem>>
    %16 = tpu.iota {dimensions = array<i32: 0>} : vector<8x8xi32>
    %17 = tpu.iota {dimensions = array<i32: 1>} : vector<8x8xi32>
    %18 = vector.broadcast %15 : i32 to vector<8x8xi32>
    %19 = arith.cmpi slt, %16, %18 : vector<8x8xi32>
    %20 = vector.broadcast %15 : i32 to vector<8x8xi32>
    %21 = arith.cmpi slt, %17, %20 : vector<8x8xi32>
    %22 = arith.andi %19, %21 : vector<8x8xi1>
    %c0_7 = arith.constant 0 : index
    %c0_8 = arith.constant 0 : index
    %23 = vector.load %arg5[%c0_7, %c0_8] : memref<32x32xf32, #tpu.memory_space<vmem>>, vector<32x32xf32>
    %24 = vector.extract_strided_slice %11 {offsets = [0, 0], sizes = [8, 8], strides = [1, 1]} : vector<8x32xf32> to vector<8x8xf32>
    %25 = vector.extract_strided_slice %12 {offsets = [0, 0], sizes = [8, 8], strides = [1, 1]} : vector<8x32xf32> to vector<8x8xf32>
    %26 = arith.truncf %24 : vector<8x8xf32> to vector<8x8xbf16>
    %27 = arith.truncf %25 : vector<8x8xf32> to vector<8x8xbf16>
    %cst_9 = arith.constant dense<0.000000e+00> : vector<8x8xf32>
    %28 = tpu.matmul %26, %27, %cst_9 {dimension_numbers = #tpu.dot_dimension_numbers<[1], [1], [0], [0], [0, 0, 1, 0], [], []>} : vector<8x8xbf16>, vector<8x8xbf16>, vector<8x8xf32> -> vector<8x8xf32>
    %cst_10 = arith.constant -1.000000e+09 : f32
    %29 = vector.broadcast %cst_10 : f32 to vector<8x8xf32>
    %30 = arith.select %22, %28, %29 : vector<8x8xi1>, vector<8x8xf32>
    %cst_11 = arith.constant dense<0xFF800000> : vector<8xf32>
    %31 = vector.multi_reduction <maximumf>, %30, %cst_11 [1] : vector<8x8xf32> to vector<8xf32>
    %32 = vector.shape_cast %31 : vector<8xf32> to vector<8x1xf32>
    %33 = vector.broadcast %32 : vector<8x1xf32> to vector<8x8xf32>
    %34 = arith.subf %30, %33 : vector<8x8xf32>
    %35 = math.exp %34 : vector<8x8xf32>
    %cst_12 = arith.constant dense<0.000000e+00> : vector<8xf32>
    %36 = vector.multi_reduction <add>, %35, %cst_12 [1] : vector<8x8xf32> to vector<8xf32>
    %37 = vector.shape_cast %36 : vector<8xf32> to vector<8x1xf32>
    %38 = tpu.reciprocal %37 {approx = true} : vector<8x1xf32> -> vector<8x1xf32>
    %39 = vector.broadcast %38 : vector<8x1xf32> to vector<8x8xf32>
    %40 = arith.mulf %35, %39 : vector<8x8xf32>
    %41 = vector.extract_strided_slice %13 {offsets = [0, 0], sizes = [8, 8], strides = [1, 1]} : vector<8x32xf32> to vector<8x8xf32>
    %42 = arith.truncf %40 : vector<8x8xf32> to vector<8x8xbf16>
    %43 = arith.truncf %41 : vector<8x8xf32> to vector<8x8xbf16>
    %cst_13 = arith.constant dense<0.000000e+00> : vector<8x8xf32>
    %44 = tpu.matmul %42, %43, %cst_13 {dimension_numbers = #tpu.dot_dimension_numbers<[1], [0], [0], [1], [0, 0, 1, 1], [], []>} : vector<8x8xbf16>, vector<8x8xbf16>, vector<8x8xf32> -> vector<8x8xf32>
    %45 = vector.extract_strided_slice %23 {offsets = [0, 0], sizes = [8, 32], strides = [1, 1]} : vector<32x32xf32> to vector<8x32xf32>
    %46 = arith.truncf %44 : vector<8x8xf32> to vector<8x8xbf16>
    %47 = arith.truncf %45 : vector<8x32xf32> to vector<8x32xbf16>
    %cst_14 = arith.constant dense<0.000000e+00> : vector<8x32xf32>
    %48 = tpu.matmul %46, %47, %cst_14 {dimension_numbers = #tpu.dot_dimension_numbers<[1], [0], [0], [1], [0, 0, 1, 1], [], []>} : vector<8x8xbf16>, vector<8x32xbf16>, vector<8x32xf32> -> vector<8x32xf32>
    %49 = vector.extract_strided_slice %11 {offsets = [0, 8], sizes = [8, 8], strides = [1, 1]} : vector<8x32xf32> to vector<8x8xf32>
    %50 = vector.extract_strided_slice %12 {offsets = [0, 8], sizes = [8, 8], strides = [1, 1]} : vector<8x32xf32> to vector<8x8xf32>
    %51 = arith.truncf %49 : vector<8x8xf32> to vector<8x8xbf16>
    %52 = arith.truncf %50 : vector<8x8xf32> to vector<8x8xbf16>
    %cst_15 = arith.constant dense<0.000000e+00> : vector<8x8xf32>
    %53 = tpu.matmul %51, %52, %cst_15 {dimension_numbers = #tpu.dot_dimension_numbers<[1], [1], [0], [0], [0, 0, 1, 0], [], []>} : vector<8x8xbf16>, vector<8x8xbf16>, vector<8x8xf32> -> vector<8x8xf32>
    %cst_16 = arith.constant -1.000000e+09 : f32
    %54 = vector.broadcast %cst_16 : f32 to vector<8x8xf32>
    %55 = arith.select %22, %53, %54 : vector<8x8xi1>, vector<8x8xf32>
    %cst_17 = arith.constant dense<0xFF800000> : vector<8xf32>
    %56 = vector.multi_reduction <maximumf>, %55, %cst_17 [1] : vector<8x8xf32> to vector<8xf32>
    %57 = vector.shape_cast %56 : vector<8xf32> to vector<8x1xf32>
    %58 = vector.broadcast %57 : vector<8x1xf32> to vector<8x8xf32>
    %59 = arith.subf %55, %58 : vector<8x8xf32>
    %60 = math.exp %59 : vector<8x8xf32>
    %cst_18 = arith.constant dense<0.000000e+00> : vector<8xf32>
    %61 = vector.multi_reduction <add>, %60, %cst_18 [1] : vector<8x8xf32> to vector<8xf32>
    %62 = vector.shape_cast %61 : vector<8xf32> to vector<8x1xf32>
    %63 = tpu.reciprocal %62 {approx = true} : vector<8x1xf32> -> vector<8x1xf32>
    %64 = vector.broadcast %63 : vector<8x1xf32> to vector<8x8xf32>
    %65 = arith.mulf %60, %64 : vector<8x8xf32>
    %66 = vector.extract_strided_slice %13 {offsets = [0, 8], sizes = [8, 8], strides = [1, 1]} : vector<8x32xf32> to vector<8x8xf32>
    %67 = arith.truncf %65 : vector<8x8xf32> to vector<8x8xbf16>
    %68 = arith.truncf %66 : vector<8x8xf32> to vector<8x8xbf16>
    %cst_19 = arith.constant dense<0.000000e+00> : vector<8x8xf32>
    %69 = tpu.matmul %67, %68, %cst_19 {dimension_numbers = #tpu.dot_dimension_numbers<[1], [0], [0], [1], [0, 0, 1, 1], [], []>} : vector<8x8xbf16>, vector<8x8xbf16>, vector<8x8xf32> -> vector<8x8xf32>
    %70 = vector.extract_strided_slice %23 {offsets = [8, 0], sizes = [8, 32], strides = [1, 1]} : vector<32x32xf32> to vector<8x32xf32>
    %71 = arith.truncf %69 : vector<8x8xf32> to vector<8x8xbf16>
    %72 = arith.truncf %70 : vector<8x32xf32> to vector<8x32xbf16>
    %cst_20 = arith.constant dense<0.000000e+00> : vector<8x32xf32>
    %73 = tpu.matmul %71, %72, %cst_20 {dimension_numbers = #tpu.dot_dimension_numbers<[1], [0], [0], [1], [0, 0, 1, 1], [], []>} : vector<8x8xbf16>, vector<8x32xbf16>, vector<8x32xf32> -> vector<8x32xf32>
    %74 = arith.addf %48, %73 : vector<8x32xf32>
    %75 = vector.extract_strided_slice %11 {offsets = [0, 16], sizes = [8, 8], strides = [1, 1]} : vector<8x32xf32> to vector<8x8xf32>
    %76 = vector.extract_strided_slice %12 {offsets = [0, 16], sizes = [8, 8], strides = [1, 1]} : vector<8x32xf32> to vector<8x8xf32>
    %77 = arith.truncf %75 : vector<8x8xf32> to vector<8x8xbf16>
    %78 = arith.truncf %76 : vector<8x8xf32> to vector<8x8xbf16>
    %cst_21 = arith.constant dense<0.000000e+00> : vector<8x8xf32>
    %79 = tpu.matmul %77, %78, %cst_21 {dimension_numbers = #tpu.dot_dimension_numbers<[1], [1], [0], [0], [0, 0, 1, 0], [], []>} : vector<8x8xbf16>, vector<8x8xbf16>, vector<8x8xf32> -> vector<8x8xf32>
    %cst_22 = arith.constant -1.000000e+09 : f32
    %80 = vector.broadcast %cst_22 : f32 to vector<8x8xf32>
    %81 = arith.select %22, %79, %80 : vector<8x8xi1>, vector<8x8xf32>
    %cst_23 = arith.constant dense<0xFF800000> : vector<8xf32>
    %82 = vector.multi_reduction <maximumf>, %81, %cst_23 [1] : vector<8x8xf32> to vector<8xf32>
    %83 = vector.shape_cast %82 : vector<8xf32> to vector<8x1xf32>
    %84 = vector.broadcast %83 : vector<8x1xf32> to vector<8x8xf32>
    %85 = arith.subf %81, %84 : vector<8x8xf32>
    %86 = math.exp %85 : vector<8x8xf32>
    %cst_24 = arith.constant dense<0.000000e+00> : vector<8xf32>
    %87 = vector.multi_reduction <add>, %86, %cst_24 [1] : vector<8x8xf32> to vector<8xf32>
    %88 = vector.shape_cast %87 : vector<8xf32> to vector<8x1xf32>
    %89 = tpu.reciprocal %88 {approx = true} : vector<8x1xf32> -> vector<8x1xf32>
    %90 = vector.broadcast %89 : vector<8x1xf32> to vector<8x8xf32>
    %91 = arith.mulf %86, %90 : vector<8x8xf32>
    %92 = vector.extract_strided_slice %13 {offsets = [0, 16], sizes = [8, 8], strides = [1, 1]} : vector<8x32xf32> to vector<8x8xf32>
    %93 = arith.truncf %91 : vector<8x8xf32> to vector<8x8xbf16>
    %94 = arith.truncf %92 : vector<8x8xf32> to vector<8x8xbf16>
    %cst_25 = arith.constant dense<0.000000e+00> : vector<8x8xf32>
    %95 = tpu.matmul %93, %94, %cst_25 {dimension_numbers = #tpu.dot_dimension_numbers<[1], [0], [0], [1], [0, 0, 1, 1], [], []>} : vector<8x8xbf16>, vector<8x8xbf16>, vector<8x8xf32> -> vector<8x8xf32>
    %96 = vector.extract_strided_slice %23 {offsets = [16, 0], sizes = [8, 32], strides = [1, 1]} : vector<32x32xf32> to vector<8x32xf32>
    %97 = arith.truncf %95 : vector<8x8xf32> to vector<8x8xbf16>
    %98 = arith.truncf %96 : vector<8x32xf32> to vector<8x32xbf16>
    %cst_26 = arith.constant dense<0.000000e+00> : vector<8x32xf32>
    %99 = tpu.matmul %97, %98, %cst_26 {dimension_numbers = #tpu.dot_dimension_numbers<[1], [0], [0], [1], [0, 0, 1, 1], [], []>} : vector<8x8xbf16>, vector<8x32xbf16>, vector<8x32xf32> -> vector<8x32xf32>
    %100 = arith.addf %74, %99 : vector<8x32xf32>
    %101 = vector.extract_strided_slice %11 {offsets = [0, 24], sizes = [8, 8], strides = [1, 1]} : vector<8x32xf32> to vector<8x8xf32>
    %102 = vector.extract_strided_slice %12 {offsets = [0, 24], sizes = [8, 8], strides = [1, 1]} : vector<8x32xf32> to vector<8x8xf32>
    %103 = arith.truncf %101 : vector<8x8xf32> to vector<8x8xbf16>
    %104 = arith.truncf %102 : vector<8x8xf32> to vector<8x8xbf16>
    %cst_27 = arith.constant dense<0.000000e+00> : vector<8x8xf32>
    %105 = tpu.matmul %103, %104, %cst_27 {dimension_numbers = #tpu.dot_dimension_numbers<[1], [1], [0], [0], [0, 0, 1, 0], [], []>} : vector<8x8xbf16>, vector<8x8xbf16>, vector<8x8xf32> -> vector<8x8xf32>
    %cst_28 = arith.constant -1.000000e+09 : f32
    %106 = vector.broadcast %cst_28 : f32 to vector<8x8xf32>
    %107 = arith.select %22, %105, %106 : vector<8x8xi1>, vector<8x8xf32>
    %cst_29 = arith.constant dense<0xFF800000> : vector<8xf32>
    %108 = vector.multi_reduction <maximumf>, %107, %cst_29 [1] : vector<8x8xf32> to vector<8xf32>
    %109 = vector.shape_cast %108 : vector<8xf32> to vector<8x1xf32>
    %110 = vector.broadcast %109 : vector<8x1xf32> to vector<8x8xf32>
    %111 = arith.subf %107, %110 : vector<8x8xf32>
    %112 = math.exp %111 : vector<8x8xf32>
    %cst_30 = arith.constant dense<0.000000e+00> : vector<8xf32>
    %113 = vector.multi_reduction <add>, %112, %cst_30 [1] : vector<8x8xf32> to vector<8xf32>
    %114 = vector.shape_cast %113 : vector<8xf32> to vector<8x1xf32>
    %115 = tpu.reciprocal %114 {approx = true} : vector<8x1xf32> -> vector<8x1xf32>
    %116 = vector.broadcast %115 : vector<8x1xf32> to vector<8x8xf32>
    %117 = arith.mulf %112, %116 : vector<8x8xf32>
    %118 = vector.extract_strided_slice %13 {offsets = [0, 24], sizes = [8, 8], strides = [1, 1]} : vector<8x32xf32> to vector<8x8xf32>
    %119 = arith.truncf %117 : vector<8x8xf32> to vector<8x8xbf16>
    %120 = arith.truncf %118 : vector<8x8xf32> to vector<8x8xbf16>
    %cst_31 = arith.constant dense<0.000000e+00> : vector<8x8xf32>
    %121 = tpu.matmul %119, %120, %cst_31 {dimension_numbers = #tpu.dot_dimension_numbers<[1], [0], [0], [1], [0, 0, 1, 1], [], []>} : vector<8x8xbf16>, vector<8x8xbf16>, vector<8x8xf32> -> vector<8x8xf32>
    %122 = vector.extract_strided_slice %23 {offsets = [24, 0], sizes = [8, 32], strides = [1, 1]} : vector<32x32xf32> to vector<8x32xf32>
    %123 = arith.truncf %121 : vector<8x8xf32> to vector<8x8xbf16>
    %124 = arith.truncf %122 : vector<8x32xf32> to vector<8x32xbf16>
    %cst_32 = arith.constant dense<0.000000e+00> : vector<8x32xf32>
    %125 = tpu.matmul %123, %124, %cst_32 {dimension_numbers = #tpu.dot_dimension_numbers<[1], [0], [0], [1], [0, 0, 1, 1], [], []>} : vector<8x8xbf16>, vector<8x32xbf16>, vector<8x32xf32> -> vector<8x32xf32>
    %126 = arith.addf %100, %125 : vector<8x32xf32>
    %c0_33 = arith.constant 0 : index
    %c0_34 = arith.constant 0 : index
    %127 = vector.load %arg6[%c0_33, %c0_34] : memref<1x32xf32, #tpu.memory_space<vmem>>, vector<1x32xf32>
    %128 = vector.broadcast %127 : vector<1x32xf32> to vector<8x32xf32>
    %129 = arith.addf %126, %128 : vector<8x32xf32>
    %130 = arith.addf %1, %129 : vector<8x32xf32>
    %c0_35 = arith.constant 0 : index
    %c0_36 = arith.constant 0 : index
    %131 = vector.load %arg7[%c0_35, %c0_36] : memref<1x32xf32, #tpu.memory_space<vmem>>, vector<1x32xf32>
    %c0_37 = arith.constant 0 : index
    %c0_38 = arith.constant 0 : index
    %132 = vector.load %arg8[%c0_37, %c0_38] : memref<1x32xf32, #tpu.memory_space<vmem>>, vector<1x32xf32>
    %cst_39 = arith.constant dense<0.000000e+00> : vector<8xf32>
    %133 = vector.multi_reduction <add>, %130, %cst_39 [1] : vector<8x32xf32> to vector<8xf32>
    %134 = vector.shape_cast %133 : vector<8xf32> to vector<8x1xf32>
    %cst_40 = arith.constant 3.200000e+01 : f32
    %135 = vector.broadcast %cst_40 : f32 to vector<8x1xf32>
    %136 = arith.divf %134, %135 : vector<8x1xf32>
    %137 = vector.broadcast %136 : vector<8x1xf32> to vector<8x32xf32>
    %138 = arith.subf %130, %137 : vector<8x32xf32>
    %139 = arith.mulf %138, %138 : vector<8x32xf32>
    %cst_41 = arith.constant dense<0.000000e+00> : vector<8xf32>
    %140 = vector.multi_reduction <add>, %139, %cst_41 [1] : vector<8x32xf32> to vector<8xf32>
    %141 = vector.shape_cast %140 : vector<8xf32> to vector<8x1xf32>
    %cst_42 = arith.constant 3.200000e+01 : f32
    %142 = vector.broadcast %cst_42 : f32 to vector<8x1xf32>
    %143 = arith.divf %141, %142 : vector<8x1xf32>
    %144 = vector.broadcast %136 : vector<8x1xf32> to vector<8x32xf32>
    %145 = arith.subf %130, %144 : vector<8x32xf32>
    %cst_43 = arith.constant 9.99999974E-6 : f32
    %146 = vector.broadcast %cst_43 : f32 to vector<8x1xf32>
    %147 = arith.addf %143, %146 : vector<8x1xf32>
    %148 = math.rsqrt %147 : vector<8x1xf32>
    %149 = vector.broadcast %148 : vector<8x1xf32> to vector<8x32xf32>
    %150 = arith.mulf %145, %149 : vector<8x32xf32>
    %151 = vector.broadcast %131 : vector<1x32xf32> to vector<8x32xf32>
    %152 = arith.mulf %150, %151 : vector<8x32xf32>
    %153 = vector.broadcast %132 : vector<1x32xf32> to vector<8x32xf32>
    %154 = arith.addf %152, %153 : vector<8x32xf32>
    %c0_44 = arith.constant 0 : index
    %c0_45 = arith.constant 0 : index
    %155 = vector.load %arg9[%c0_44, %c0_45] : memref<32x64xf32, #tpu.memory_space<vmem>>, vector<32x64xf32>
    %156 = arith.truncf %154 : vector<8x32xf32> to vector<8x32xbf16>
    %157 = arith.truncf %155 : vector<32x64xf32> to vector<32x64xbf16>
    %cst_46 = arith.constant dense<0.000000e+00> : vector<8x64xf32>
    %158 = tpu.matmul %156, %157, %cst_46 {dimension_numbers = #tpu.dot_dimension_numbers<[1], [0], [0], [1], [0, 0, 1, 1], [], []>} : vector<8x32xbf16>, vector<32x64xbf16>, vector<8x64xf32> -> vector<8x64xf32>
    %c0_47 = arith.constant 0 : index
    %c0_48 = arith.constant 0 : index
    %159 = vector.load %arg10[%c0_47, %c0_48] : memref<1x64xf32, #tpu.memory_space<vmem>>, vector<1x64xf32>
    %160 = vector.broadcast %159 : vector<1x64xf32> to vector<8x64xf32>
    %161 = arith.addf %158, %160 : vector<8x64xf32>
    %cst_49 = arith.constant 5.000000e-01 : f32
    %162 = vector.broadcast %cst_49 : f32 to vector<8x64xf32>
    %163 = arith.mulf %162, %161 : vector<8x64xf32>
    %cst_50 = arith.constant 4.471500e-02 : f32
    %164 = vector.broadcast %cst_50 : f32 to vector<8x64xf32>
    %165 = arith.mulf %164, %161 : vector<8x64xf32>
    %166 = arith.mulf %165, %161 : vector<8x64xf32>
    %167 = arith.mulf %166, %161 : vector<8x64xf32>
    %168 = arith.addf %161, %167 : vector<8x64xf32>
    %cst_51 = arith.constant 0.797884583 : f32
    %169 = vector.broadcast %cst_51 : f32 to vector<8x64xf32>
    %170 = arith.mulf %169, %168 : vector<8x64xf32>
    %171 = math.tanh %170 : vector<8x64xf32>
    %cst_52 = arith.constant 1.000000e+00 : f32
    %172 = vector.broadcast %cst_52 : f32 to vector<8x64xf32>
    %173 = arith.addf %172, %171 : vector<8x64xf32>
    %174 = arith.mulf %163, %173 : vector<8x64xf32>
    %c0_53 = arith.constant 0 : index
    %c0_54 = arith.constant 0 : index
    %175 = vector.load %arg11[%c0_53, %c0_54] : memref<64x32xf32, #tpu.memory_space<vmem>>, vector<64x32xf32>
    %176 = arith.truncf %174 : vector<8x64xf32> to vector<8x64xbf16>
    %177 = arith.truncf %175 : vector<64x32xf32> to vector<64x32xbf16>
    %cst_55 = arith.constant dense<0.000000e+00> : vector<8x32xf32>
    %178 = tpu.matmul %176, %177, %cst_55 {dimension_numbers = #tpu.dot_dimension_numbers<[1], [0], [0], [1], [0, 0, 1, 1], [], []>} : vector<8x64xbf16>, vector<64x32xbf16>, vector<8x32xf32> -> vector<8x32xf32>
    %c0_56 = arith.constant 0 : index
    %c0_57 = arith.constant 0 : index
    %179 = vector.load %arg12[%c0_56, %c0_57] : memref<1x32xf32, #tpu.memory_space<vmem>>, vector<1x32xf32>
    %180 = vector.broadcast %179 : vector<1x32xf32> to vector<8x32xf32>
    %181 = arith.addf %178, %180 : vector<8x32xf32>
    %182 = arith.addf %154, %181 : vector<8x32xf32>
    %c0_58 = arith.constant 0 : index
    %c0_59 = arith.constant 0 : index
    %183 = vector.load %arg13[%c0_58, %c0_59] : memref<1x32xf32, #tpu.memory_space<vmem>>, vector<1x32xf32>
    %c0_60 = arith.constant 0 : index
    %c0_61 = arith.constant 0 : index
    %184 = vector.load %arg14[%c0_60, %c0_61] : memref<1x32xf32, #tpu.memory_space<vmem>>, vector<1x32xf32>
    %cst_62 = arith.constant dense<0.000000e+00> : vector<8xf32>
    %185 = vector.multi_reduction <add>, %182, %cst_62 [1] : vector<8x32xf32> to vector<8xf32>
    %186 = vector.shape_cast %185 : vector<8xf32> to vector<8x1xf32>
    %cst_63 = arith.constant 3.200000e+01 : f32
    %187 = vector.broadcast %cst_63 : f32 to vector<8x1xf32>
    %188 = arith.divf %186, %187 : vector<8x1xf32>
    %189 = vector.broadcast %188 : vector<8x1xf32> to vector<8x32xf32>
    %190 = arith.subf %182, %189 : vector<8x32xf32>
    %191 = arith.mulf %190, %190 : vector<8x32xf32>
    %cst_64 = arith.constant dense<0.000000e+00> : vector<8xf32>
    %192 = vector.multi_reduction <add>, %191, %cst_64 [1] : vector<8x32xf32> to vector<8xf32>
    %193 = vector.shape_cast %192 : vector<8xf32> to vector<8x1xf32>
    %cst_65 = arith.constant 3.200000e+01 : f32
    %194 = vector.broadcast %cst_65 : f32 to vector<8x1xf32>
    %195 = arith.divf %193, %194 : vector<8x1xf32>
    %196 = vector.broadcast %188 : vector<8x1xf32> to vector<8x32xf32>
    %197 = arith.subf %182, %196 : vector<8x32xf32>
    %cst_66 = arith.constant 9.99999974E-6 : f32
    %198 = vector.broadcast %cst_66 : f32 to vector<8x1xf32>
    %199 = arith.addf %195, %198 : vector<8x1xf32>
    %200 = math.rsqrt %199 : vector<8x1xf32>
    %201 = vector.broadcast %200 : vector<8x1xf32> to vector<8x32xf32>
    %202 = arith.mulf %197, %201 : vector<8x32xf32>
    %203 = vector.broadcast %183 : vector<1x32xf32> to vector<8x32xf32>
    %204 = arith.mulf %202, %203 : vector<8x32xf32>
    %205 = vector.broadcast %184 : vector<1x32xf32> to vector<8x32xf32>
    %206 = arith.addf %204, %205 : vector<8x32xf32>
    %c0_67 = arith.constant 0 : index
    %c0_68 = arith.constant 0 : index
    %c0_69 = arith.constant 0 : index
    %207 = vector.load %arg15[%c0_67, %c0_68, %c0_69] : memref<1x8x32xf32, #tpu.memory_space<vmem>>, vector<1x8x32xf32>
    %208 = vector.shape_cast %207 : vector<1x8x32xf32> to vector<8x32xf32>
    %209 = vector.shape_cast %206 : vector<8x32xf32> to vector<1x8x32xf32>
    tpu.vector_store %arg15[%c0_67, %c0_68, %c0_69], %209 {strides = array<i32>} : memref<1x8x32xf32, #tpu.memory_space<vmem>>, vector<1x8x32xf32>,
    return
  }
  func.func @transform_0(%arg0: i32, %arg1: memref<2xi32, #tpu.memory_space<smem>>) -> (i32, i32, i32) {
    %c0_i32 = arith.constant 0 : i32
    %c0_i32_0 = arith.constant 0 : i32
    %c0_i32_1 = arith.constant 0 : i32
    return %arg0, %c0_i32, %c0_i32_0 : i32, i32, i32
  }
  func.func @transform_1(%arg0: i32, %arg1: memref<2xi32, #tpu.memory_space<smem>>) -> (i32, i32) {
    %c0_i32 = arith.constant 0 : i32
    %c0_i32_0 = arith.constant 0 : i32
    %c0_i32_1 = arith.constant 0 : i32
    return %c0_i32, %c0_i32_0 : i32, i32
  }
  func.func @transform_2(%arg0: i32, %arg1: memref<2xi32, #tpu.memory_space<smem>>) -> (i32, i32) {
    %c0_i32 = arith.constant 0 : i32
    %c0_i32_0 = arith.constant 0 : i32
    %c0_i32_1 = arith.constant 0 : i32
    return %c0_i32, %c0_i32_0 : i32, i32
  }
  func.func @transform_3(%arg0: i32, %arg1: memref<2xi32, #tpu.memory_space<smem>>) -> (i32, i32) {
    %c0_i32 = arith.constant 0 : i32
    %c0_i32_0 = arith.constant 0 : i32
    %c0_i32_1 = arith.constant 0 : i32
    return %c0_i32, %c0_i32_0 : i32, i32
  }
  func.func @transform_4(%arg0: i32, %arg1: memref<2xi32, #tpu.memory_space<smem>>) -> (i32, i32) {
    %c0_i32 = arith.constant 0 : i32
    %c0_i32_0 = arith.constant 0 : i32
    %c0_i32_1 = arith.constant 0 : i32
    return %c0_i32, %c0_i32_0 : i32, i32
  }
  func.func @transform_5(%arg0: i32, %arg1: memref<2xi32, #tpu.memory_space<smem>>) -> (i32, i32) {
    %c0_i32 = arith.constant 0 : i32
    %c0_i32_0 = arith.constant 0 : i32
    %c0_i32_1 = arith.constant 0 : i32
    return %c0_i32, %c0_i32_0 : i32, i32
  }
  func.func @transform_6(%arg0: i32, %arg1: memref<2xi32, #tpu.memory_space<smem>>) -> (i32, i32) {
    %c0_i32 = arith.constant 0 : i32
    %c0_i32_0 = arith.constant 0 : i32
    %c0_i32_1 = arith.constant 0 : i32
    return %c0_i32, %c0_i32_0 : i32, i32
  }
  func.func @transform_7(%arg0: i32, %arg1: memref<2xi32, #tpu.memory_space<smem>>) -> (i32, i32) {
    %c0_i32 = arith.constant 0 : i32
    %c0_i32_0 = arith.constant 0 : i32
    %c0_i32_1 = arith.constant 0 : i32
    return %c0_i32, %c0_i32_0 : i32, i32
  }
  func.func @transform_8(%arg0: i32, %arg1: memref<2xi32, #tpu.memory_space<smem>>) -> (i32, i32) {
    %c0_i32 = arith.constant 0 : i32
    %c0_i32_0 = arith.constant 0 : i32
    %c0_i32_1 = arith.constant 0 : i32
    return %c0_i32, %c0_i32_0 : i32, i32
  }
  func.func @transform_9(%arg0: i32, %arg1: memref<2xi32, #tpu.memory_space<smem>>) -> (i32, i32) {
    %c0_i32 = arith.constant 0 : i32
    %c0_i32_0 = arith.constant 0 : i32
    %c0_i32_1 = arith.constant 0 : i32
    return %c0_i32, %c0_i32_0 : i32, i32
  }
  func.func @transform_10(%arg0: i32, %arg1: memref<2xi32, #tpu.memory_space<smem>>) -> (i32, i32) {
    %c0_i32 = arith.constant 0 : i32
    %c0_i32_0 = arith.constant 0 : i32
    %c0_i32_1 = arith.constant 0 : i32
    return %c0_i32, %c0_i32_0 : i32, i32
  }
  func.func @transform_11(%arg0: i32, %arg1: memref<2xi32, #tpu.memory_space<smem>>) -> (i32, i32) {
    %c0_i32 = arith.constant 0 : i32
    %c0_i32_0 = arith.constant 0 : i32
    %c0_i32_1 = arith.constant 0 : i32
    return %c0_i32, %c0_i32_0 : i32, i32
  }
  func.func @transform_12(%arg0: i32, %arg1: memref<2xi32, #tpu.memory_space<smem>>) -> (i32, i32) {
    %c0_i32 = arith.constant 0 : i32
    %c0_i32_0 = arith.constant 0 : i32
    %c0_i32_1 = arith.constant 0 : i32
    return %c0_i32, %c0_i32_0 : i32, i32
  }
  func.func @transform_13(%arg0: i32, %arg1: memref<2xi32, #tpu.memory_space<smem>>) -> (i32, i32, i32) {
    %c0_i32 = arith.constant 0 : i32
    %c0_i32_0 = arith.constant 0 : i32
    %c0_i32_1 = arith.constant 0 : i32
    return %arg0, %c0_i32, %c0_i32_0 : i32, i32, i32
  }
}

</mosaic_0001>

<bundles_post_ra>
// kernel: bert_mlm_forward.4
= control target key start
LH: loop header
LB: loop body
LE: loop exit
PB: predicated region body
PF: predicated region fallthrough
CT: control target
= control target key end

     0   :  { %s301_s12 = smov 0   ;;  %s327_s0 = inlined_call_operand.vmem [shape: f32[2,8,32], index: 0, kind: input, shape index: {}]   ;;  %s328_s1 = inlined_call_operand.vmem [shape: f32[1,32], index: 1, kind: input, shape index: {}]   ;;  %s329_s2 = inlined_call_operand.vmem [shape: f32[1,32], index: 2, kind: input, shape index: {}]   ;;  %s330_s3 = inlined_call_operand.vmem [shape: f32[2,8,32], index: 3, kind: output, shape index: {}]  }
   0x1 LB: > { %s252_s13 = sadd.s32 4294967295, %s279_s12   ;;  %p256_p0 = scmp.ge.s32.totalorder %s279_s12, 1  ;;  %s279_s12 = sphi %s301_s12, %s13_s12  }
   0x2   : > { %p136_p1 = scmp.lt.s32.totalorder %s279_s12, 3 }
   0x4   : > { %p137_p2 = pnand %p256_p0, %p136_p1 }
   0x5   : > { %p158_p3 = scmp.lt.s32.totalorder (!%p137_p2), %s252_s13, 1  ;;  %vm169_vm0 = vcmask (!%p137_p2), 261120   ;;  %v259_v11 = vld [vmem:[%s328_s1] ss:$0 sm:$0xff] (!%p137_p2) }
   0x6   : > { %140 = sbr.rel (%p137_p2) target bundleno = 331 (0x14b), region = 32  ;;  %v260_v13 = vld [vmem:[%s329_s2] ss:$0 sm:$0xff] (!%p137_p2) }
   0xd   : > { %s332_s13 = smov (!%p158_p3, %s252_s13), 1 }
   0xe   : > { %s257_s14 = sshll.u32 %s332_s13, 3 }
   0xf   : > { %s161_s17 = scalar_lea.vmem %s327_s0, %s257_s14  ;;  %s165_s24 = scalar_lea.vmem %s330_s3, %s257_s14 }
  0x10   : > { %v166_v0 = vld [vmem:[%s161_s17] sm:$0xff] }
  0x11   : > { %v170_v1 = vsel %vm169_vm0, %v166_v0, 0.0 }
  0x12   : > { %171 = vadd.xlane.f32.xlu0 %v170_v1 }
  0x9f   : > { %v172_v2 = vpop.xlane.xlu0 %171 }
  0xa0   : > { %v174_v3 = vmul.f32 0.03125, %v172_v2 }
  0xa2   : > { %v175_v4 = vsub.f32 %v166_v0, %v174_v3 }
  0xa4   : > { %v176_v5 = vmul.f32 %v175_v4, %v175_v4 }
  0xa6   : > { %v177_v6 = vsel %vm169_vm0, %v176_v5, 0.0 }
  0xa7   : > { %178 = vadd.xlane.f32.xlu0 %v177_v6 }
 0x134   : > { %v179_v7 = vpop.xlane.xlu0 %178 }
 0x135   : > { %v180_v8 = vmul.f32 0.03125, %v179_v7 }
 0x137   : > { %v181_v9 = vadd.f32 1e-05, %v180_v8 }
 0x139   : > { %271 = vrsqrt.f32 %v181_v9 }
 0x143   : > { %v272_v10 = vpop.eup %271 }
 0x144   : > { %v183_v12 = vmul.f32 %v272_v10, %v175_v4 }
 0x146   : > { %v190_v14 = vmul.f32 %v259_v11, %v183_v12 }
 0x148   : > { %v197_v15 = vadd.f32 %v260_v13, %v190_v14 }
 0x14a   : > { %198 = vst.msk [vmem:[%s165_s24] sm:$0xff] %vm169_vm0, %v197_v15 }
 0x14b PF: > { %s13_s12 = sadd.s32 1, %s279_s12  }
 0x14c   : > { %p10_p4 = scmp.ge.s32.totalorder %s13_s12, 4  }
 0x14e   :  { %12 = sbr.rel (!%p10_p4) target bundleno = 1 (0x1), region = 62 }

// kernel: bert_mlm_forward.7
= control target key start
LH: loop header
LB: loop body
LE: loop exit
PB: predicated region body
PF: predicated region fallthrough
CT: control target
= control target key end

     0   :  { %12 = vsyncpa [#allocation3], 0  ;;  %s834_s0 = inlined_call_operand.vmem [shape: f32[2,8,32], index: 0, kind: input, shape index: {}]   ;;  %s835_s1 = inlined_call_operand.vmem [shape: f32[32,32], index: 1, kind: input, shape index: {}]   ;;  %s836_s2 = inlined_call_operand.vmem [shape: f32[1,32], index: 2, kind: input, shape index: {}]   ;;  %s837_s3 = inlined_call_operand.vmem [shape: f32[1,32], index: 3, kind: input, shape index: {}]   ;;  %s838_s4 = inlined_call_operand.vmem [shape: f32[1,32], index: 4, kind: input, shape index: {}]   ;;  %s839_s5 = inlined_call_operand.vmem [shape: f32[32,128], index: 5, kind: input, shape index: {}]   ;;  %s840_s6 = inlined_call_operand.vmem [shape: f32[1,128], index: 6, kind: input, shape index: {}]   ;;  %s841_s7 = inlined_call_operand.hbm [shape: f32[2,8,128], index: 7, kind: output, shape index: {}]  }
   0x1   :  { %14 = vsyncpa [#allocation3 + $0x1], 0  ;;  %s694_s24 = smov 0   ;;  %s696_s25 = smov 0  }
   0x2   :  { %s698_s26 = smov 0   ;;  %s700_s27 = smov 0  }
   0x3 LB: > { %s715_s28 = sadd.s32 4294967295, %s649_s27   ;;  %s504_s29 = sadd.s32 4294967294, %s649_s27   ;;  %s649_s27 = sphi %s700_s27, %s847_s27   ;;  %s645_s26 = sphi %s698_s26, %s846_s26   ;;  %s641_s25 = sphi %s696_s25, %s845_s25   ;;  %s637_s24 = sphi %s694_s24, %s844_s24  }
   0x4   : > { %s719_s30 = sadd.s32 1, %s649_s27   ;;  %s179_s8 = sadd.s32 1, %s645_s26 }
   0x5   : > { %s176_s9 = ssub.s32 %s649_s27, %s719_s30  ;;  %p189_p0 = scmp.ne.s32.totalorder %s645_s26, %s641_s25 }
   0x6   : > { %p177_p1 = scmp.eq.s32.totalorder %s176_s9, 0  ;;  %p190_p2 = scmp.eq.s32.totalorder %s715_s28, 1 }
   0x7   : > { %p195_p3 = scmp.ne.s32.totalorder %s641_s25, %s637_s24  ;;  %p196_p4 = scmp.eq.s32.totalorder %s504_s29, 1 }
   0x8   : > { %s730_s10 = scalar_select %p177_p1, %s645_s26, %s179_s8  }
   0x9   : > { %p732_p5 = por %p190_p2, %p189_p0  ;;  %p736_p6 = por %p196_p4, %p195_p3 }
   0xa   : > { %p507_p7 = scmp.ge.s32.totalorder %s649_s27, 1  ;;  %p239_p8 = scmp.lt.s32.totalorder %s649_s27, 3 }
   0xc   : > { %p240_p9 = pnand %p507_p7, %p239_p8 }
   0xd   : > { %v276_v0 = vld [vmem:[%s835_s1] sm:$0xff] (!%p240_p9)  ;;  %v277_v1 = vld [vmem:[%s835_s1 + $0x8] sm:$0xff] (!%p240_p9)  ;;  %v278_v2 = vld [vmem:[%s835_s1 + $0x10] sm:$0xff] (!%p240_p9)  ;;  %p270_p10 = scmp.lt.s32.totalorder (!%p240_p9), %s715_s28, 1  ;;  %v651_v3 = vmov (!%p240_p9), 0.0   ;;  %vm652_vm0 = vmmov (!%p240_p9), 0  }
   0xe   : > { %243 = sbr.rel (%p240_p9) target bundleno = 810 (0x32a), region = 48  ;;  %526 = vmatprep.subr.bf16.mxu0 (!%p240_p9), %v651_v3  ;;  %v281_v4 = vpack.c.bf16 (!%p240_p9), %v277_v1, %v276_v0  ;;  %v279_v5 = vld [vmem:[%s835_s1 + $0x18] sm:$0xff] (!%p240_p9)  ;;  %530 = vmatprep.mubr.msk.bf16.mxu0 (!%p240_p9), %vm652_vm0, %v651_v3  ;;  %vm290_vm1 = vcmask (!%p240_p9), 261120   ;;  %v510_v9 = vld [vmem:[%s836_s2] ss:$0 sm:$0xff] (!%p240_p9)  ;;  %v374_v31 = vld [vmem:[%s839_s5 + $0x8] sm:$0xff] (!%p240_p9) }
   0xf   : > { %534 = vmatprep.subr.bf16.mxu1 (!%p240_p9), %v651_v3  ;;  %538 = vmatprep.mubr.msk.bf16.mxu1 (!%p240_p9), %vm652_vm0, %v651_v3  ;;  %v282_v6 = vpack.c.bf16 (!%p240_p9), %v279_v5, %v278_v2  ;;  %v373_v30 = vld [vmem:[%s839_s5] sm:$0xff] (!%p240_p9)  ;;  %v375_v33 = vld [vmem:[%s839_s5 + $0x10] sm:$0xff] (!%p240_p9)  ;;  %v376_v34 = vld [vmem:[%s839_s5 + $0x18] sm:$0xff] (!%p240_p9)  ;;  %s267_s9 = sand.u32 (!%p240_p9), 1, %s641_s25   ;;  %s517_s16 = sshll.u32 (!%p240_p9), %s715_s28, 7 }
  0x10   : > { %527 = vmatpush3.bf16.msra.mxu0 (!%p240_p9), %v281_v4  ;;  %v378_v32 = vpack.c.bf16 (!%p240_p9), %v374_v31, %v373_v30  ;;  %v379_v35 = vpack.c.bf16 (!%p240_p9), %v376_v34, %v375_v33  ;;  %v512_v40 = vld [vmem:[%s837_s3] ss:$0 sm:$0xff] (!%p240_p9)  ;;  %s508_s13 = sshll.u32 (!%p240_p9), %s267_s9, 3  ;;  %s653_s23 = smov (!%p240_p9), [#allocation2]  }
  0x11   : > { %528 = vmatprep.subr.bf16.mxu0 (!%p240_p9), %v651_v3  ;;  %v513_v42 = vld [vmem:[%s838_s4] ss:$0 sm:$0xff] (!%p240_p9)  ;;  %s269_s17 = scalar_lea.vmem (!%p240_p9), [#allocation2], %s508_s13  ;;  %s591_s29 = sshll.u32 (!%p240_p9), %s653_s23, 4  ;;  %s592_s29 = int_to_ptr.vmem [resolvable:$false] %s591_s29 }
  0x12   : > { %535 = vmatpush3.bf16.msra.mxu1 (!%p240_p9), %v378_v32  ;;  %v514_v46 = vld [vmem:[%s840_s6] ss:$0 sm:$0xff] (!%p240_p9)  ;;  %s445_s18 = sshll.u32 (!%p240_p9), %s269_s17, 4  ;;  %s794_s18 = int_to_ptr.vmem [resolvable:$true] %s445_s18 }
  0x13   : > { %536 = vmatprep.subr.bf16.mxu1 (!%p240_p9), %v651_v3  ;;  %p594_p0 = scmp.lt.s32.totalorder (!%p240_p9), %s794_s18, %s592_s29 }
  0x14   : > { %529 = vmatpush3.bf16.msra.mxu0 (!%p240_p9), %v282_v6 }
  0x15   : > { %s271_s21 = scalar_select %p270_p10, %s715_s28, 1 }
  0x16   : > { %537 = vmatpush3.bf16.msra.mxu1 %v379_v35  ;;  %s587_s28 = scalar_lea.vmem %s794_s18, 128 }
  0x17   : > { %s509_s22 = sshll.u32 %s271_s21, 3  ;;  %s792_s21 = scalar_lea.hbm %s841_s7, %s517_s16 }
  0x18   : > { %s273_s8 = scalar_lea.vmem %s834_s0, %s509_s22  ;;  %s432_s22 = scalar_lea.sflag [#allocation3], %s267_s9 }
  0x19   : > { %v275_v7 = vld [vmem:[%s273_s8] sm:$0xff]  ;;  %p588_p11 = scmp.ne.s32.totalorder %s794_s18, %s587_s28  ;;  %s593_s8 = scalar_lea.vmem %s592_s29, 256 }
  0x1a   : > { %v280_v8 = vpack.c.bf16 %v275_v7, %v275_v7  ;;  %p595_p1 = scmp.lt.s32.totalorder %s593_s8, %s587_s28 }
  0x1b   : > { %p589_p12 = pnand %p588_p11, %p732_p5 }
  0x1c   : > { %531 = vmatmul.mubr.msk.bf16.vlgmr.msra.gmra.mrb[0].mxu0 %vm290_vm1, %v280_v8  ;;  %p596_p2 = por %p595_p1, %p594_p0 }
  0x1d   : > { %p590_p13 = pneg %p589_p12 }
  0x1f   : > { %p597_p3 = pnand %p596_p2, %p590_p13 }
  0xef   : > { %v328_v10 = vpop.f32.mrb[0].mxu0 }
  0xf0   : > { %v329_v11 = vadd.f32 %v510_v9, %v328_v10  ;;  %v532_v12 = vpop.f32.mrb[1].mxu0 }
  0xf1   : > { %v331_v13 = vpop.f32.mrb[2].mxu0 }
  0xf2   : > { %v335_v14 = vmul.f32 0.044715, %v329_v11  ;;  %v533_v15 = vpop.f32.mrb[3].mxu0  ;;  %v334_v21 = vmul.f32 0.5, %v329_v11 }
  0xf4   : > { %v336_v16 = vmul.f32 %v335_v14, %v329_v11 }
  0xf6   : > { %v337_v17 = vmul.f32 %v336_v16, %v329_v11 }
  0xf8   : > { %v338_v18 = vadd.f32 %v337_v17, %v329_v11 }
  0xfa   : > { %v339_v19 = vmul.f32 0.7978846, %v338_v18 }
  0xfc   : > { %583 = vtanh.f32 %v339_v19 }
 0x106   : > { %v584_v20 = vpop.eup %583 }
 0x107   : > { %v341_v22 = vadd.f32 1.0, %v584_v20 }
 0x109   : > { %v342_v23 = vmul.f32 %v341_v22, %v334_v21 }
 0x10b   : > { %v345_v24 = vsel %vm290_vm1, %v342_v23, 0.0 }
 0x10c   : > { %346 = vadd.xlane.f32.xlu0 %v345_v24 }
 0x199   : > { %v347_v25 = vpop.xlane.xlu0 %346 }
 0x19a   : > { %v349_v26 = vmul.f32 0.03125, %v347_v25 }
 0x19c   : > { %v350_v27 = vsub.f32 %v342_v23, %v349_v26 }
 0x19e   : > { %v351_v28 = vmul.f32 %v350_v27, %v350_v27 }
 0x1a0   : > { %v352_v29 = vsel %vm290_vm1, %v351_v28, 0.0 }
 0x1a1   : > { %353 = vadd.xlane.f32.xlu0 %v352_v29 }
 0x22e   : > { %v354_v36 = vpop.xlane.xlu0 %353 }
 0x22f   : > { %v355_v37 = vmul.f32 0.03125, %v354_v36 }
 0x231   : > { %v356_v38 = vadd.f32 1e-05, %v355_v37 }
 0x233   : > { %585 = vrsqrt.f32 %v356_v38 }
 0x23d   : > { %v586_v39 = vpop.eup %585 }
 0x23e   : > { %v358_v41 = vmul.f32 %v586_v39, %v350_v27 }
 0x240   : > { %v365_v43 = vmul.f32 %v512_v40, %v358_v41 }
 0x242   : > { %v372_v44 = vadd.f32 %v513_v42, %v365_v43 }
 0x244   : > { %v377_v45 = vpack.c.bf16 %v372_v44, %v372_v44 }
 0x246   : > { %539 = vmatmul.mubr.msk.bf16.vlgmr.msra.gmra.mrb[0].mxu1 %vm290_vm1, %v377_v45 }
 0x319   : > { %v424_v47 = vpop.f32.mrb[0].mxu1 }
 0x31a   : > { %v425_v48 = vadd.f32 %v514_v46, %v424_v47  ;;  %v540_v49 = vpop.f32.mrb[1].mxu1 }
 0x31b   : > { %v427_v50 = vpop.f32.mrb[2].mxu1 }
 0x31c   : > { %430 = vst [vmem:[%s269_s17] sm:$0xff] %v425_v48  ;;  %v541_v51 = vpop.f32.mrb[3].mxu1 }
 0x31d   : > { %600 = shalt.err (!%p597_p3)
}
 0x31e   : > { %s601_s9 = scalar_lea.hbm %s792_s21, 128  ;;  %s605_s15 = scalar_lea.hbm %s841_s7, 256 }
 0x31f   : > { %p602_p4 = scmp.ne.s32.totalorder %s792_s21, %s601_s9  ;;  %p606_p9 = scmp.lt.u32.totalorder %s792_s21, %s841_s7 }
 0x320   : > { %p607_p10 = scmp.lt.u32.totalorder %s605_s15, %s601_s9  ;;  %p609_p12 = scmp.lt.u32.totalorder %s601_s9, %s792_s21 }
 0x321   : > { %p603_p7 = pnand %p602_p4, %p732_p5 }
 0x322   : > { %p608_p11 = por %p607_p10, %p606_p9 }
 0x323   : > { %p604_p8 = pneg %p603_p7 }
 0x324   : > { %p610_p13 = por %p609_p12, %p608_p11 }
 0x326   : > { %p611_p0 = pnand %p610_p13, %p604_p8 }
 0x328   : > { %614 = shalt.err (!%p611_p0)
}
 0x329   : > { %542 = dma.vmem_to_hbm [thread:$0]  (%p732_p5), %s794_s18, 128, %s792_s21, %s432_s22  }
 0x32a PF: > { %p548_p1 = scmp.ge.s32.totalorder %s649_s27, 2  ;;  %s457_s19 = sand.u32 1, %s637_s24  }
 0x32b   : > { %s458_s20 = scalar_lea.sflag [#allocation3], %s457_s19 }
 0x32c   : > { %p545_p2 = pnand %p548_p1, %p736_p6 }
 0x32e   : > { %632 = dma.done.wait (!%p545_p2), %s458_s20, 128  }
 0x32f   : > { %634 = vsyncadd (!%p545_p2), %s458_s20, 4294967168  ;;  %p17_p3 = scmp.ge.s32.totalorder %s719_s30, 4   ;;  %s844_s24 = smov %s641_s25 }
 0x330   : > { %s845_s25 = smov %s645_s26  ;;  %s846_s26 = smov %s730_s10 }
 0x331   : > { %s847_s27 = smov %s719_s30  ;;  %19 = sbr.rel (!%p17_p3) target bundleno = 3 (0x3), region = 83 }
 0x338   :  { %463 = vsyncpa [#allocation3], 1 }
 0x339   :  { %465 = vsyncpa [#allocation3 + $0x1], 1 }

// kernel: bert_mlm_forward.5
= control target key start
LH: loop header
LB: loop body
LE: loop exit
PB: predicated region body
PF: predicated region fallthrough
CT: control target
= control target key end

     0   :  { %s1975_s0 = inlined_call_operand.vmem [shape: s32[2], index: 0, kind: input, shape index: {}]   ;;  %s1976_s1 = inlined_call_operand.vmem [shape: f32[2,8,32], index: 1, kind: input, shape index: {}]   ;;  %s1977_s2 = inlined_call_operand.vmem [shape: f32[32,96], index: 2, kind: input, shape index: {}]   ;;  %s1978_s3 = inlined_call_operand.vmem [shape: f32[1,96], index: 3, kind: input, shape index: {}]   ;;  %s1979_s4 = inlined_call_operand.vmem [shape: f32[32,32], index: 4, kind: input, shape index: {}]   ;;  %s1980_s5 = inlined_call_operand.vmem [shape: f32[1,32], index: 5, kind: input, shape index: {}]   ;;  %s1981_s6 = inlined_call_operand.vmem [shape: f32[1,32], index: 6, kind: input, shape index: {}]   ;;  %s1982_s7 = inlined_call_operand.vmem [shape: f32[1,32], index: 7, kind: input, shape index: {}]   ;;  %s1983_s8 = inlined_call_operand.vmem [shape: f32[32,64], index: 8, kind: input, shape index: {}]   ;;  %s1984_s9 = inlined_call_operand.vmem [shape: f32[1,64], index: 9, kind: input, shape index: {}]   ;;  %s1985_s10 = inlined_call_operand.vmem [shape: f32[64,32], index: 10, kind: input, shape index: {}]   ;;  %s1986_s11 = inlined_call_operand.vmem [shape: f32[1,32], index: 11, kind: input, shape index: {}]   ;;  %s1987_s12 = inlined_call_operand.vmem [shape: f32[1,32], index: 12, kind: input, shape index: {}]   ;;  %s1988_s13 = inlined_call_operand.vmem [shape: f32[1,32], index: 13, kind: input, shape index: {}]   ;;  %s1989_s14 = inlined_call_operand.vmem [shape: f32[2,8,32], index: 14, kind: output, shape index: {}]  }
   0x1   :  { %s19_s15 = sshll.u32 %s1975_s0, 4  ;;  %s20_s15 = int_to_ptr.vmem [resolvable:$true] %s19_s15 }
   0x2   :  { %s1623_s16 = scalar_lea.vmem %s20_s15, 16  ;;  %p1628_p1 = scmp.lt.s32.totalorder %s20_s15, %s20_s15 }
   0x3   :  { %p1624_p0 = scmp.ne.s32.totalorder %s20_s15, %s1623_s16  ;;  %p1629_p2 = scmp.lt.s32.totalorder %s1623_s16, %s1623_s16 }
   0x5   :  { %p1630_p3 = por %p1629_p2, %p1628_p1 }
   0x7   :  { %p1631_p4 = pnand %p1630_p3, %p1624_p0 }
   0x9   :  { %1634 = shalt.err (!%p1631_p4)  }
   0xa   :  { %s1645_s17 = smov [#allocation3]  }
   0xb   :  { %22 = dma.vmem_to_smem %s20_s15, 16, %s1645_s17, [#allocation2] }
   0xc   :  { %1639 = dma.done.wait [#allocation2], 16 }
   0xd   :  { %1640 = vsyncadd [#allocation2], 4294967280 }
   0xe   :  { %24 = sfence }
   0xf   :  { %s1737_s18 = smov 0  }
  0x10 LB: > { %s1743_s0 = sadd.s32 4294967295, %s1643_s18   ;;  %p1416_p5 = scmp.ge.s32.totalorder %s1643_s18, 1  ;;  %s1643_s18 = sphi %s1737_s18, %s30_s18  }
  0x11   : > { %p393_p6 = scmp.lt.s32.totalorder %s1643_s18, 3 }
  0x13   : > { %p394_p7 = pnand %p1416_p5, %p393_p6 }
  0x14   : > { %v445_v0 = vld [vmem:[%s1977_s2] sm:$0xff] (!%p394_p7)  ;;  %v446_v1 = vld [vmem:[%s1977_s2 + $0x8] sm:$0xff] (!%p394_p7)  ;;  %v447_v2 = vld [vmem:[%s1977_s2 + $0x10] sm:$0xff] (!%p394_p7)  ;;  %p435_p8 = scmp.lt.s32.totalorder (!%p394_p7), %s1743_s0, 1  ;;  %v1646_v3 = vmov (!%p394_p7), 0.0   ;;  %vm1647_vm0 = vmmov (!%p394_p7), 0   ;;  %v505_v23 = vlaneseq (!%p394_p7) }
  0x15   : > { %397 = sbr.rel (%p394_p7) target bundleno = 3717 (0xe85), region = 72  ;;  %1479 = vmatprep.subr.bf16.mxu1 (!%p394_p7), %v1646_v3  ;;  %v450_v4 = vpack.c.bf16 (!%p394_p7), %v446_v1, %v445_v0  ;;  %v448_v5 = vld [vmem:[%s1977_s2 + $0x18] sm:$0xff] (!%p394_p7)  ;;  %1483 = vmatprep.mubr.msk.bf16.mxu1 (!%p394_p7), %vm1647_vm0, %v1646_v3  ;;  %vm459_vm1 = vcmask (!%p394_p7), 261120   ;;  %v1419_v9 = vld [vmem:[%s1978_s3] ss:$0 sm:$0xff] (!%p394_p7)  ;;  %s1648_s19 = smov (!%p394_p7), 96  }
  0x16   : > { %1493 = vmatprep.subr.bf16.mxu0 (!%p394_p7), %v1646_v3  ;;  %1495 = vmatprep.mubr.msk.bf16.mxu0 (!%p394_p7), %vm1647_vm0, %v1646_v3  ;;  %v451_v6 = vpack.c.bf16 (!%p394_p7), %v448_v5, %v447_v2  ;;  %s1649_s20 = smov (!%p394_p7), 120   ;;  %s1650_s21 = smov (!%p394_p7), 88   ;;  %vm522_vm2 = vcmask (!%p394_p7), 64512   ;;  %v506_v24 = vshrl.u32 (!%p394_p7), %v505_v23, 7  ;;  %v508_v25 = vand.u32 (!%p394_p7), 127, %v505_v23  ;;  %v513_v62 = vld [vmem:[%s1979_s4] sm:$0xff] (!%p394_p7) }
  0x17   : > { %1480 = vmatpush3.bf16.msra.mxu1 (!%p394_p7), %v450_v4  ;;  %s504_s22 = sld [smem:[#allocation3 + %s1743_s0]] (!%p394_p7)  ;;  %s1652_s23 = smov (!%p394_p7), 56   ;;  %vm587_vm6 = vcmask (!%p394_p7), 1043456   ;;  %v632_v63 = vpack.c.bf16 (!%p394_p7), %v513_v62, %v513_v62  ;;  %v514_v0 = vld [vmem:[%s1979_s4 + $0x8] sm:$0xff] (!%p394_p7)  ;;  %vm1284_vm7 = vcmask (!%p394_p7), 523264  }
  0x18   : > { %1481 = vmatprep.subr.bf16.mxu1 (!%p394_p7), %v1646_v3  ;;  %s1653_s24 = smov (!%p394_p7), 112   ;;  %s1654_s25 = smov (!%p394_p7), 80   ;;  %v746_v2 = vpack.c.bf16 (!%p394_p7), %v514_v0, %v514_v0 }
  0x19   : > { %v797_v1 = vsel (!%p394_p7), %vm587_vm6, %v632_v63, 0  ;;  %s1655_s16 = smov (!%p394_p7), 72   ;;  %s1656_s17 = smov (!%p394_p7), 104  }
  0x1a   : > { %v751_v4 = vsel (!%p394_p7), %vm587_vm6, %v746_v2, 0 }
  0x1b   : > { %1482 = vmatpush3.bf16.msra.mxu1 (!%p394_p7), %v451_v6 }
  0x1c   : > { %s1764_s27 = scalar_select %p435_p8, %s1743_s0, 1  ;;  %1487 = vmatprep.subr.bf16.mxu1 %v1646_v3 }
  0x1d   : > { %v509_v26 = vstv %s504_s22  ;;  %s1651_s0 = smov 64   ;;  %s1658_s22 = smov 40  }
  0x1e   : > { %s1417_s28 = sshll.u32 %s1764_s27, 3  ;;  %vm510_vm3 = vcmp.lt.s32.totalorder %v506_v24, %v509_v26  ;;  %vm511_vm4 = vcmp.lt.s32.totalorder %v508_v25, %v509_v26 }
  0x1f   : > { %s438_s15 = scalar_lea.vmem %s1976_s1, %s1417_s28  ;;  %vm1806_vm5 = vmand %vm510_vm3, %vm511_vm4 }
  0x20   : > { %v1776_v7 = vld [vmem:[%s438_s15] sm:$0xff] }
  0x21   : > { %v449_v8 = vpack.c.bf16 %v1776_v7, %v1776_v7 }
  0x23   : > { %1484 = vmatmul.mubr.msk.bf16.vlgmr.msra.gmra.mrb[0].mxu1 %vm459_vm1, %v449_v8 }
  0x24   : > { %1489 = vmatprep.mubr.msk.bf16.mxu1 %vm1647_vm0, %v1646_v3 }
  0xf6   : > { %v497_v10 = vpop.f32.mrb[0].mxu1 }
  0xf7   : > { %v498_v11 = vadd.f32 %v1419_v9, %v497_v10  ;;  %v1485_v12 = vpop.f32.mrb[1].mxu1 }
  0xf8   : > { %v500_v13 = vpop.f32.mrb[2].mxu1 }
  0xf9   : > { %v503_v14 = vmul.f32 0.35355338, %v498_v11  ;;  %v1787_v15 = vpack.c.bf16 %v498_v11, %v498_v11  ;;  %v1486_v16 = vpop.f32.mrb[3].mxu1 }
  0xfb   : > { %v1789_v17 = vpack.c.bf16 %v503_v14, %v503_v14  ;;  %520 = vrot.lane.b32.xlu0 %v1787_v15, %s1648_s19  ;;  %s1657_s19 = smov 48  }
  0xfd   : > { %634 = vrot.lane.b32.xlu1 %v1789_v17, %s1649_s20 }
  0xff   : > { %636 = vrot.lane.b32.xlu0 %v1787_v15, %s1650_s21 }
 0x16d   : > { %v521_v18 = vpop.permute.xlu0 %520 }
 0x16e   : > { %v527_v19 = vsel %vm522_vm2, %v521_v18, 0 }
 0x16f   : > { %1488 = vmatpush3.bf16.xpose.msra.mxu1 %v527_v19  ;;  %v635_v22 = vpop.permute.xlu1 %634 }
 0x170   : > { %1499 = vmatprep.subr.bf16.mxu1 %v1646_v3 }
 0x171   : > { %v637_v20 = vpop.permute.xlu0 %636 }
 0x172   : > { %v642_v21 = vsel %vm522_vm2, %v637_v20, 0 }
 0x176   : > { %1490 = vmatmul.mubr.msk.bf16.vlgmr.msra.gmra.mrb[4].mxu1 %vm522_vm2, %v1789_v17 }
 0x177   : > { %1500 = vmatpush3.bf16.xpose.msra.mxu1 %v642_v21  ;;  %1501 = vmatprep.mubr.msk.bf16.mxu1 %vm1647_vm0, %v1646_v3 }
 0x178   : > { %1511 = vmatprep.subr.bf16.mxu1 %v1646_v3 }
 0x17e   : > { %1502 = vmatmul.mubr.msk.bf16.vlgmr.msra.gmra.mrb[8].mxu1 %vm522_vm2, %v635_v22 }
 0x17f   : > { %1513 = vmatprep.mubr.msk.bf16.mxu1 %vm1647_vm0, %v1646_v3  ;;  %1512 = vmatpush3.bf16.msra.mxu1 %v751_v4 }
 0x180   : > { %1523 = vmatprep.subr.bf16.mxu1 %v1646_v3 }
 0x249   : > { %v563_v28 = vpop.f32.mrb[4].mxu1 }
 0x24a   : > { %v569_v29 = vsel %vm1806_vm5, %v563_v28, -1e+09  ;;  %v1491_v30 = vpop.f32.mrb[5].mxu1 }
 0x24b   : > { %v566_v31 = vpop.f32.mrb[6].mxu1  ;;  %v570_v32 = vsel %vm522_vm2, %v569_v29, -inf }
 0x24c   : > { %571 = vmax.xlane.f32.xlu1 %v570_v32  ;;  %v1492_v33 = vpop.f32.mrb[7].mxu1 }
 0x251   : > { %v678_v34 = vpop.f32.mrb[8].mxu1 }
 0x252   : > { %v684_v35 = vsel %vm1806_vm5, %v678_v34, -1e+09  ;;  %v1503_v36 = vpop.f32.mrb[9].mxu1 }
 0x253   : > { %v681_v37 = vpop.f32.mrb[10].mxu1  ;;  %v685_v38 = vsel %vm522_vm2, %v684_v35, -inf }
 0x254   : > { %686 = vmax.xlane.f32.xlu0 %v685_v38  ;;  %v1504_v39 = vpop.f32.mrb[11].mxu1 }
 0x2d9   : > { %v572_v40 = vpop.xlane.xlu1 %571 }
 0x2da   : > { %v573_v41 = vsub.f32 %v569_v29, %v572_v40 }
 0x2dc   : > { %v574_v42 = vmul.f32 1.442695, %v573_v41 }
 0x2de   : > { %1601 = vpow2.f32 %v574_v42 }
 0x2e1   : > { %v687_v43 = vpop.xlane.xlu0 %686 }
 0x2e2   : > { %v688_v44 = vsub.f32 %v684_v35, %v687_v43 }
 0x2e4   : > { %v689_v45 = vmul.f32 1.442695, %v688_v44 }
 0x2e6   : > { %1603 = vpow2.f32 %v689_v45 }
 0x2e8   : > { %v1602_v46 = vpop.eup %1601 }
 0x2e9   : > { %v576_v47 = vsel %vm522_vm2, %v1602_v46, 0.0 }
 0x2ea   : > { %577 = vadd.xlane.f32.xlu0 %v576_v47 }
 0x2f0   : > { %v1604_v48 = vpop.eup %1603 }
 0x2f1   : > { %v691_v49 = vsel %vm522_vm2, %v1604_v48, 0.0 }
 0x2f2   : > { %692 = vadd.xlane.f32.xlu1 %v691_v49 }
 0x300   : > { %582 = vrot.lane.b32.xlu0 %v1787_v15, %s1651_s0  ;;  %s442_s0 = scalar_lea.vmem %s1989_s14, %s1417_s28 }
 0x303   : > { %697 = vrot.lane.b32.xlu1 %v1787_v15, %s1652_s23 }
 0x304   : > { %839 = vrot.lane.b32.xlu0 %v1789_v17, %s1653_s24 }
 0x307   : > { %841 = vrot.lane.b32.xlu1 %v1787_v15, %s1654_s25 }
 0x377   : > { %v578_v50 = vpop.xlane.xlu0 %577 }
 0x378   : > { %1605 = vrcp.f32 %v578_v50  ;;  %v515_v50 = vld [vmem:[%s1979_s4 + $0x10] sm:$0xff] }
 0x37b   : > { %v583_v51 = vpop.permute.xlu0 %582 }
 0x37c   : > { %v589_v52 = vsel %vm587_vm6, %v583_v51, 0  ;;  %v951_v51 = vpack.c.bf16 %v515_v50, %v515_v50 }
 0x37d   : > { %1494 = vmatpush3.bf16.msra.mxu0 %v589_v52 }
 0x37e   : > { %1505 = vmatprep.subr.bf16.mxu0 %v1646_v3  ;;  %v956_v52 = vsel %vm587_vm6, %v951_v51, 0  ;;  %v1435_v51 = vld [vmem:[%s1982_s7] ss:$0 sm:$0xff] }
 0x37f   : > { %v693_v53 = vpop.xlane.xlu1 %692  ;;  %v840_v20 = vpop.permute.xlu0 %839 }
 0x380   : > { %1607 = vrcp.f32 %v693_v53 }
 0x382   : > { %v1606_v54 = vpop.eup %1605 }
 0x383   : > { %v580_v55 = vmul.f32 %v1606_v54, %v1602_v46  ;;  %v698_v56 = vpop.permute.xlu1 %697 }
 0x384   : > { %v703_v58 = vsel %vm587_vm6, %v698_v56, 0 }
 0x385   : > { %v581_v57 = vpack.c.bf16 %v580_v55, %v580_v55 }
 0x387   : > { %1496 = vmatmul.mubr.msk.bf16.vlgmr.msra.gmra.mrb[0].mxu0 %vm522_vm2, %v581_v57  ;;  %v842_v11 = vpop.permute.xlu1 %841 }
 0x388   : > { %1506 = vmatpush3.bf16.msra.mxu0 %v703_v58  ;;  %1507 = vmatprep.mubr.msk.bf16.mxu0 %vm1647_vm0, %v1646_v3  ;;  %v847_v18 = vsel %vm522_vm2, %v842_v11, 0 }
 0x389   : > { %1517 = vmatprep.subr.bf16.mxu0 %v1646_v3 }
 0x38a   : > { %v1608_v59 = vpop.eup %1607 }
 0x38b   : > { %v695_v60 = vmul.f32 %v1608_v59, %v1604_v48 }
 0x38d   : > { %v696_v61 = vpack.c.bf16 %v695_v60, %v695_v60 }
 0x38f   : > { %1508 = vmatmul.mubr.msk.bf16.vlgmr.msra.gmra.mrb[4].mxu0 %vm522_vm2, %v696_v61 }
 0x390   : > { %1519 = vmatprep.mubr.msk.bf16.mxu0 %vm1647_vm0, %v1646_v3  ;;  %1518 = vmatpush3.bf16.msra.mxu0 %v797_v1 }
 0x391   : > { %1529 = vmatprep.subr.bf16.mxu0 %v1646_v3 }
 0x45a   : > { %v625_v5 = vpop.f32.mrb[0].mxu0 }
 0x45b   : > { %v631_v6 = vpack.c.bf16 %v625_v5, %v625_v5  ;;  %v1497_v8 = vpop.f32.mrb[1].mxu0 }
 0x45c   : > { %v628_v9 = vpop.f32.mrb[2].mxu0  ;;  %v516_v8 = vld [vmem:[%s1979_s4 + $0x18] sm:$0xff] }
 0x45d   : > { %v1498_v10 = vpop.f32.mrb[3].mxu0  ;;  %1520 = vmatmul.mubr.msk.bf16.vlgmr.msra.gmra.mrb[8].mxu0 %vm522_vm2, %v631_v6  ;;  %v1111_v9 = vpack.c.bf16 %v516_v8, %v516_v8 }
 0x45e   : > { %1531 = vmatprep.mubr.msk.bf16.mxu0 %vm1647_vm0, %v1646_v3 }
 0x462   : > { %v739_v12 = vpop.f32.mrb[4].mxu0 }
 0x463   : > { %v745_v13 = vpack.c.bf16 %v739_v12, %v739_v12  ;;  %v1509_v14 = vpop.f32.mrb[5].mxu0 }
 0x464   : > { %v742_v16 = vpop.f32.mrb[6].mxu0 }
 0x465   : > { %v1510_v19 = vpop.f32.mrb[7].mxu0  ;;  %1514 = vmatmul.mubr.msk.bf16.vlgmr.msra.gmra.mrb[12].mxu1 %vm522_vm2, %v745_v13 }
 0x466   : > { %1524 = vmatpush3.bf16.xpose.msra.mxu1 %v847_v18  ;;  %1525 = vmatprep.mubr.msk.bf16.mxu1 %vm1647_vm0, %v1646_v3 }
 0x467   : > { %1535 = vmatprep.subr.bf16.mxu1 %v1646_v3 }
 0x46d   : > { %1526 = vmatmul.mubr.msk.bf16.vlgmr.msra.gmra.mrb[16].mxu1 %vm522_vm2, %v840_v20 }
 0x46e   : > { %1537 = vmatprep.mubr.msk.bf16.mxu1 %vm1647_vm0, %v1646_v3  ;;  %1536 = vmatpush3.bf16.msra.mxu1 %v956_v52 }
 0x46f   : > { %1547 = vmatprep.subr.bf16.mxu1 %v1646_v3 }
 0x530   : > { %v833_v21 = vpop.f32.mrb[8].mxu0 }
 0x531   : > { %v1521_v22 = vpop.f32.mrb[9].mxu0 }
 0x532   : > { %v836_v23 = vpop.f32.mrb[10].mxu0 }
 0x533   : > { %v1522_v24 = vpop.f32.mrb[11].mxu0 }
 0x538   : > { %v787_v25 = vpop.f32.mrb[12].mxu1 }
 0x539   : > { %v1853_v26 = vadd.f32 %v833_v21, %v787_v25  ;;  %v1515_v28 = vpop.f32.mrb[13].mxu1 }
 0x53a   : > { %v790_v29 = vpop.f32.mrb[14].mxu1  ;;  %v1433_v28 = vld [vmem:[%s1980_s5] ss:$0 sm:$0xff] }
 0x53b   : > { %v1516_v30 = vpop.f32.mrb[15].mxu1 }
 0x540   : > { %v883_v31 = vpop.f32.mrb[16].mxu1 }
 0x541   : > { %v889_v32 = vsel %vm1806_vm5, %v883_v31, -1e+09  ;;  %v1527_v33 = vpop.f32.mrb[17].mxu1 }
 0x542   : > { %v886_v34 = vpop.f32.mrb[18].mxu1  ;;  %v890_v35 = vsel %vm522_vm2, %v889_v32, -inf }
 0x543   : > { %891 = vmax.xlane.f32.xlu1 %v890_v35  ;;  %v1528_v36 = vpop.f32.mrb[19].mxu1 }
 0x554   : > { %1001 = vrot.lane.b32.xlu1 %v1787_v15, %s1655_s16 }
 0x558   : > { %999 = vrot.lane.b32.xlu1 %v1789_v17, %s1656_s17 }
 0x5d0   : > { %v892_v37 = vpop.xlane.xlu1 %891 }
 0x5d1   : > { %v893_v38 = vsub.f32 %v889_v32, %v892_v37 }
 0x5d3   : > { %v894_v39 = vmul.f32 1.442695, %v893_v38 }
 0x5d4   : > { %v1002_v46 = vpop.permute.xlu1 %1001 }
 0x5d5   : > { %1609 = vpow2.f32 %v894_v39  ;;  %v1007_v48 = vsel %vm522_vm2, %v1002_v46, 0 }
 0x5d8   : > { %v1000_v49 = vpop.permute.xlu1 %999 }
 0x5df   : > { %v1610_v40 = vpop.eup %1609 }
 0x5e0   : > { %v896_v41 = vsel %vm522_vm2, %v1610_v40, 0.0 }
 0x5e1   : > { %897 = vadd.xlane.f32.xlu0 %v896_v41  ;;  %v1198_v41 = vld [vmem:[%s1983_s8] sm:$0xff] }
 0x5f7   : > { %902 = vrot.lane.b32.xlu0 %v1787_v15, %s1657_s19 }
 0x66e   : > { %v898_v42 = vpop.xlane.xlu0 %897 }
 0x66f   : > { %1611 = vrcp.f32 %v898_v42  ;;  %v1199_v42 = vld [vmem:[%s1983_s8 + $0x8] sm:$0xff] }
 0x672   : > { %v903_v43 = vpop.permute.xlu0 %902 }
 0x673   : > { %v908_v44 = vsel %vm587_vm6, %v903_v43, 0  ;;  %v1203_v43 = vpack.c.bf16 %v1199_v42, %v1198_v41 }
 0x674   : > { %1530 = vmatpush3.bf16.msra.mxu0 %v908_v44  ;;  %v1201_v44 = vld [vmem:[%s1983_s8 + $0x18] sm:$0xff] }
 0x675   : > { %1541 = vmatprep.subr.bf16.mxu0 %v1646_v3 }
 0x679   : > { %v1612_v17 = vpop.eup %1611 }
 0x67a   : > { %v900_v45 = vmul.f32 %v1612_v17, %v1610_v40 }
 0x67c   : > { %v901_v47 = vpack.c.bf16 %v900_v45, %v900_v45 }
 0x67e   : > { %1532 = vmatmul.mubr.msk.bf16.vlgmr.msra.gmra.mrb[12].mxu0 %vm522_vm2, %v901_v47 }
 0x67f   : > { %1542 = vmatpush3.bf16.xpose.msra.mxu0 %v1007_v48  ;;  %1543 = vmatprep.mubr.msk.bf16.mxu0 %vm1647_vm0, %v1646_v3 }
 0x680   : > { %1553 = vmatprep.subr.bf16.mxu0 %v1646_v3 }
 0x686   : > { %1544 = vmatmul.mubr.msk.bf16.vlgmr.msra.gmra.mrb[16].mxu0 %vm522_vm2, %v1000_v49  ;;  %v1434_v49 = vld [vmem:[%s1981_s6] ss:$0 sm:$0xff] }
 0x687   : > { %1555 = vmatprep.mubr.msk.bf16.mxu0 %vm1647_vm0, %v1646_v3 }
 0x751   : > { %v944_v53 = vpop.f32.mrb[12].mxu0 }
 0x752   : > { %v950_v54 = vpack.c.bf16 %v944_v53, %v944_v53  ;;  %v1533_v55 = vpop.f32.mrb[13].mxu0 }
 0x753   : > { %v947_v56 = vpop.f32.mrb[14].mxu0  ;;  %v1264_v55 = vld [vmem:[%s1985_s10] sm:$0xff] }
 0x754   : > { %v1534_v57 = vpop.f32.mrb[15].mxu0  ;;  %1538 = vmatmul.mubr.msk.bf16.vlgmr.msra.gmra.mrb[20].mxu1 %vm522_vm2, %v950_v54  ;;  %v1265_v56 = vld [vmem:[%s1985_s10 + $0x8] sm:$0xff] }
 0x755   : > { %1549 = vmatprep.mubr.msk.bf16.mxu1 %vm1647_vm0, %v1646_v3  ;;  %v1266_v57 = vld [vmem:[%s1985_s10 + $0x10] sm:$0xff] }
 0x759   : > { %v1043_v58 = vpop.f32.mrb[16].mxu0 }
 0x75a   : > { %v1049_v59 = vsel %vm1806_vm5, %v1043_v58, -1e+09  ;;  %v1545_v60 = vpop.f32.mrb[17].mxu0  ;;  %v1273_v58 = vpack.c.bf16 %v1265_v56, %v1264_v55 }
 0x75b   : > { %v1046_v61 = vpop.f32.mrb[18].mxu0  ;;  %v1050_v62 = vsel %vm522_vm2, %v1049_v59, -inf }
 0x75c   : > { %1051 = vmax.xlane.f32.xlu0 %v1050_v62  ;;  %v1546_v63 = vpop.f32.mrb[19].mxu0  ;;  %v1268_v61 = vld [vmem:[%s1985_s10 + $0x20] sm:$0xff]  ;;  %v1269_v62 = vld [vmem:[%s1985_s10 + $0x28] sm:$0xff] }
 0x75d   : > { %v1275_v63 = vpack.c.bf16 %v1269_v62, %v1268_v61 }
 0x772   : > { %1062 = vrot.lane.b32.xlu0 %v1787_v15, %s1658_s22  ;;  %v1116_v15 = vsel %vm587_vm6, %v1111_v9, 0 }
 0x773   : > { %1554 = vmatpush3.bf16.msra.mxu0 %v1116_v15 }
 0x774   : > { %1567 = vmatprep.subr.bf16.mxu0 %v1646_v3 }
 0x7e9   : > { %v1052_v0 = vpop.xlane.xlu0 %1051 }
 0x7ea   : > { %v1053_v1 = vsub.f32 %v1049_v59, %v1052_v0  ;;  %v1267_v59 = vld [vmem:[%s1985_s10 + $0x18] sm:$0xff]  ;;  %v1270_v0 = vld [vmem:[%s1985_s10 + $0x30] sm:$0xff] }
 0x7eb   : > { %v1274_v60 = vpack.c.bf16 %v1267_v59, %v1266_v57 }
 0x7ec   : > { %v1054_v2 = vmul.f32 1.442695, %v1053_v1  ;;  %v1271_v1 = vld [vmem:[%s1985_s10 + $0x38] sm:$0xff] }
 0x7ed   : > { %v1063_v4 = vpop.permute.xlu0 %1062 }
 0x7ee   : > { %1613 = vpow2.f32 %v1054_v2  ;;  %v1068_v5 = vsel %vm587_vm6, %v1063_v4, 0  ;;  %v1276_v2 = vpack.c.bf16 %v1271_v1, %v1270_v0  ;;  %v1436_v4 = vld [vmem:[%s1984_s9] ss:$0 sm:$0xff] }
 0x7ef   : > { %1548 = vmatpush3.bf16.msra.mxu1 %v1068_v5 }
 0x7f0   : > { %1559 = vmatprep.subr.bf16.mxu1 %v1646_v3 }
 0x7f8   : > { %v1614_v27 = vpop.eup %1613 }
 0x7f9   : > { %v1056_v6 = vsel %vm522_vm2, %v1614_v27, 0.0 }
 0x7fa   : > { %1057 = vadd.xlane.f32.xlu1 %v1056_v6 }
 0x827   : > { %v992_v10 = vpop.f32.mrb[20].mxu1 }
 0x828   : > { %v998_v11 = vadd.f32 %v992_v10, %v1853_v26  ;;  %v1539_v12 = vpop.f32.mrb[21].mxu1 }
 0x829   : > { %v995_v13 = vpop.f32.mrb[22].mxu1 }
 0x82a   : > { %v1540_v14 = vpop.f32.mrb[23].mxu1 }
 0x887   : > { %v1058_v16 = vpop.xlane.xlu1 %1057 }
 0x888   : > { %1615 = vrcp.f32 %v1058_v16 }
 0x892   : > { %v1616_v18 = vpop.eup %1615 }
 0x893   : > { %v1060_v19 = vmul.f32 %v1616_v18, %v1614_v27 }
 0x895   : > { %v1061_v20 = vpack.c.bf16 %v1060_v19, %v1060_v19 }
 0x897   : > { %1550 = vmatmul.mubr.msk.bf16.vlgmr.msra.gmra.mrb[24].mxu1 %vm522_vm2, %v1061_v20  ;;  %v1438_v20 = vld [vmem:[%s1986_s11] ss:$0 sm:$0xff] }
 0x898   : > { %1563 = vmatprep.mubr.msk.bf16.mxu1 %vm1647_vm0, %v1646_v3  ;;  %1560 = vmatpush3.bf16.msra.mxu1 %v1203_v43 }
 0x899   : > { %1561 = vmatprep.subr.bf16.mxu1 %v1646_v3 }
 0x96a   : > { %v1104_v21 = vpop.f32.mrb[24].mxu1 }
 0x96b   : > { %v1110_v22 = vpack.c.bf16 %v1104_v21, %v1104_v21  ;;  %v1551_v23 = vpop.f32.mrb[25].mxu1 }
 0x96c   : > { %v1107_v24 = vpop.f32.mrb[26].mxu1 }
 0x96d   : > { %v1552_v25 = vpop.f32.mrb[27].mxu1  ;;  %1556 = vmatmul.mubr.msk.bf16.vlgmr.msra.gmra.mrb[20].mxu0 %vm522_vm2, %v1110_v22 }
 0x96e   : > { %1575 = vmatprep.mubr.msk.bf16.mxu0 %vm1647_vm0, %v1646_v3  ;;  %1568 = vmatpush3.bf16.msra.mxu0 %v1273_v58 }
 0x96f   : > { %1569 = vmatprep.subr.bf16.mxu0 %v1646_v3 }
 0x972   : > { %1570 = vmatpush3.bf16.msra.mxu0 %v1274_v60 }
 0x973   : > { %1571 = vmatprep.subr.bf16.mxu0 %v1646_v3 }
 0x976   : > { %1572 = vmatpush3.bf16.msra.mxu0 %v1275_v63 }
 0x977   : > { %1573 = vmatprep.subr.bf16.mxu0 %v1646_v3 }
 0x97a   : > { %1574 = vmatpush3.bf16.msra.mxu0 %v1276_v2 }
 0xa40   : > { %v1152_v26 = vpop.f32.mrb[20].mxu0 }
 0xa41   : > { %v1158_v29 = vadd.f32 %v1152_v26, %v998_v11  ;;  %v1557_v30 = vpop.f32.mrb[21].mxu0 }
 0xa42   : > { %v1155_v31 = vpop.f32.mrb[22].mxu0 }
 0xa43   : > { %v1166_v32 = vadd.f32 %v1433_v28, %v1158_v29  ;;  %v1558_v33 = vpop.f32.mrb[23].mxu0 }
 0xa45   : > { %v1167_v34 = vadd.f32 %v1166_v32, %v1776_v7  ;;  %v1200_v7 = vld [vmem:[%s1983_s8 + $0x10] sm:$0xff] }
 0xa46   : > { %v1204_v17 = vpack.c.bf16 %v1201_v44, %v1200_v7 }
 0xa47   : > { %v1170_v35 = vsel %vm459_vm1, %v1167_v34, 0.0 }
 0xa48   : > { %1171 = vadd.xlane.f32.xlu1 %v1170_v35  ;;  %1562 = vmatpush3.bf16.msra.mxu1 %v1204_v17 }
 0xad5   : > { %v1172_v36 = vpop.xlane.xlu1 %1171 }
 0xad6   : > { %v1174_v37 = vmul.f32 0.03125, %v1172_v36 }
 0xad8   : > { %v1175_v38 = vsub.f32 %v1167_v34, %v1174_v37 }
 0xada   : > { %v1176_v39 = vmul.f32 %v1175_v38, %v1175_v38 }
 0xadc   : > { %v1177_v40 = vsel %vm459_vm1, %v1176_v39, 0.0 }
 0xadd   : > { %1178 = vadd.xlane.f32.xlu1 %v1177_v40  ;;  %v1441_v40 = vld [vmem:[%s1988_s13] ss:$0 sm:$0xff] }
 0xb6a   : > { %v1179_v45 = vpop.xlane.xlu1 %1178 }
 0xb6b   : > { %v1180_v46 = vmul.f32 0.03125, %v1179_v45 }
 0xb6d   : > { %v1181_v47 = vadd.f32 1e-05, %v1180_v46 }
 0xb6f   : > { %1617 = vrsqrt.f32 %v1181_v47 }
 0xb79   : > { %v1618_v48 = vpop.eup %1617 }
 0xb7a   : > { %v1183_v50 = vmul.f32 %v1618_v48, %v1175_v38  ;;  %v1440_v38 = vld [vmem:[%s1987_s12] ss:$0 sm:$0xff] }
 0xb7c   : > { %v1190_v52 = vmul.f32 %v1434_v49, %v1183_v50 }
 0xb7e   : > { %v1197_v53 = vadd.f32 %v1435_v51, %v1190_v52 }
 0xb80   : > { %v1202_v54 = vpack.c.bf16 %v1197_v53, %v1197_v53 }
 0xb82   : > { %1564 = vmatmul.mubr.msk.bf16.vlgmr.msra.gmra.mrb[28].mxu1 %vm459_vm1, %v1202_v54 }
 0xc55   : > { %v1249_v5 = vpop.f32.mrb[28].mxu1 }
 0xc56   : > { %v1250_v27 = vadd.f32 %v1436_v4, %v1249_v5  ;;  %v1565_v6 = vpop.f32.mrb[29].mxu1 }
 0xc57   : > { %v1252_v8 = vpop.f32.mrb[30].mxu1 }
 0xc58   : > { %v1256_v9 = vmul.f32 0.044715, %v1250_v27  ;;  %v1566_v15 = vpop.f32.mrb[31].mxu1  ;;  %v1255_v16 = vmul.f32 0.5, %v1250_v27 }
 0xc5a   : > { %v1257_v10 = vmul.f32 %v1256_v9, %v1250_v27 }
 0xc5c   : > { %v1258_v11 = vmul.f32 %v1257_v10, %v1250_v27 }
 0xc5e   : > { %v1259_v12 = vadd.f32 %v1258_v11, %v1250_v27 }
 0xc60   : > { %v1260_v13 = vmul.f32 0.7978846, %v1259_v12 }
 0xc62   : > { %1619 = vtanh.f32 %v1260_v13 }
 0xc6c   : > { %v1620_v14 = vpop.eup %1619 }
 0xc6d   : > { %v1262_v18 = vadd.f32 1.0, %v1620_v14 }
 0xc6f   : > { %v1263_v3 = vmul.f32 %v1262_v18, %v1255_v16 }
 0xc71   : > { %v1272_v19 = vpack.c.bf16 %v1263_v3, %v1263_v3 }
 0xc73   : > { %1576 = vmatmul.mubr.msk.bf16.vlgmr.msra.gmra.mrb[24].mxu0 %vm1284_vm7, %v1272_v19 }
 0xd46   : > { %v1322_v21 = vpop.f32.mrb[24].mxu0 }
 0xd47   : > { %v1323_v22 = vadd.f32 %v1438_v20, %v1322_v21  ;;  %v1577_v23 = vpop.f32.mrb[25].mxu0 }
 0xd48   : > { %v1325_v24 = vpop.f32.mrb[26].mxu0 }
 0xd49   : > { %v1578_v25 = vpop.f32.mrb[27].mxu0  ;;  %v1328_v26 = vadd.f32 %v1323_v22, %v1197_v53 }
 0xd4b   : > { %v1331_v28 = vsel %vm459_vm1, %v1328_v26, 0.0 }
 0xd4c   : > { %1332 = vadd.xlane.f32.xlu1 %v1331_v28 }
 0xdd9   : > { %v1333_v29 = vpop.xlane.xlu1 %1332 }
 0xdda   : > { %v1334_v30 = vmul.f32 0.03125, %v1333_v29 }
 0xddc   : > { %v1335_v31 = vsub.f32 %v1328_v26, %v1334_v30 }
 0xdde   : > { %v1336_v32 = vmul.f32 %v1335_v31, %v1335_v31 }
 0xde0   : > { %v1337_v33 = vsel %vm459_vm1, %v1336_v32, 0.0 }
 0xde1   : > { %1338 = vadd.xlane.f32.xlu1 %v1337_v33 }
 0xe6e   : > { %v1339_v34 = vpop.xlane.xlu1 %1338 }
 0xe6f   : > { %v1340_v35 = vmul.f32 0.03125, %v1339_v34 }
 0xe71   : > { %v1341_v36 = vadd.f32 1e-05, %v1340_v35 }
 0xe73   : > { %1621 = vrsqrt.f32 %v1341_v36 }
 0xe7d   : > { %v1622_v37 = vpop.eup %1621 }
 0xe7e   : > { %v1343_v39 = vmul.f32 %v1622_v37, %v1335_v31 }
 0xe80   : > { %v1350_v41 = vmul.f32 %v1440_v38, %v1343_v39 }
 0xe82   : > { %v1357_v42 = vadd.f32 %v1441_v40, %v1350_v41 }
 0xe84   : > { %1358 = vst.msk [vmem:[%s442_s0] sm:$0xff] %vm459_vm1, %v1357_v42 }
 0xe85 PF: > { %s30_s18 = sadd.s32 1, %s1643_s18  }
 0xe86   : > { %p27_p9 = scmp.ge.s32.totalorder %s30_s18, 4  }
 0xe88   :  { %29 = sbr.rel (!%p27_p9) target bundleno = 16 (0x10), region = 102 }

</bundles_post_ra>
